<compile_context>
chip_gen: v6e
topology: v6e:2x2x1
jax: 0.10.0
libtpu: 0.0.40
codegen_flags: <defaults>
</compile_context>

<pallas_src>
import functools

import jax
import jax.numpy as jnp
from jax.experimental import pallas as pl
from jax.experimental.pallas import tpu as pltpu


def _int_pow(base, n):
    """base ** n for a static non-negative integer n, via repeated squaring."""
    if n == 0:
        return jnp.ones_like(base)
    result = None
    b = base
    while n:
        if n & 1:
            result = b if result is None else result * b
        n >>= 1
        if n:
            b = b * b
    return result


def _asl_row_kernel(x_ref, y_ref, out_ref, *, gamma_neg, gamma_pos, clip, eps,
                    n_classes, binary_targets):
    """Per-row (pos_loss + neg_loss) for a (tb, C) tile -> (1, tb) output."""
    x = x_ref[...].astype(jnp.float32)
    t = y_ref[...].astype(jnp.float32)            # targets

    # sigmoid as a single EUP op (tanh) instead of exp + reciprocal.
    xs_pos = 0.5 * jnp.tanh(0.5 * x) + 0.5
    xs_neg = jnp.minimum((1.0 - xs_pos) + clip, 1.0)   # xs_neg.add_(clip).clamp_(max=1)
    if clip < eps:
        # After the +clip clamp xs_neg >= clip, so the eps clamp is a no-op
        # whenever clip >= eps (the default); only emit it otherwise.
        xs_neg = jnp.maximum(xs_neg, eps)

    gp, gn = float(gamma_pos), float(gamma_neg)
    use_focal = (gn > 0) or (gp > 0)

    if binary_targets:
        # Exact for t in {0, 1}: one log per element instead of two.
        is_pos = t > 0.5
        p = jnp.where(is_pos, jnp.maximum(xs_pos, eps), xs_neg)
        loss = jnp.log(p)
        if use_focal:
            # NOTE: kept inside the differentiable graph, matching the
            # reference module (no no_grad() around the focal weight).
            base = jnp.where(is_pos, 1.0 - xs_pos, 1.0 - xs_neg)
            if gp.is_integer() and gn.is_integer() and 0 <= gp <= 8 and 0 <= gn <= 8:
                # Integer gammas -> pure VPU multiplies, no EUP exp/log.
                w = jnp.where(is_pos,
                              _int_pow(base, int(gp)),
                              _int_pow(base, int(gn)))
            else:
                w = jnp.power(base, jnp.where(is_pos, gp, gn))
            loss = loss * w
        pos_num = jnp.sum(jnp.where(is_pos, loss, 0.0), axis=1)   # (tb,)
    else:
        # General (soft-label) path: exact mirror of the reference blend.
        anti_t = 1.0 - t
        loss = t * jnp.log(jnp.maximum(xs_pos, eps)) + anti_t * jnp.log(xs_neg)
        if use_focal:
            base = 1.0 - xs_pos * t - xs_neg * anti_t
            w = jnp.power(base, gp * t + gn * anti_t)
            loss = loss * w
        pos_num = jnp.sum(t * loss, axis=1)                        # (tb,)

    # Three class-axis (XLU) reductions; negative-branch numerator/denominator
    # derived from totals (algebraically exact, matches torch up to summation
    # order).
    total = jnp.sum(loss, axis=1)                 # (tb,) == pos_num + neg_num
    pos_cnt = jnp.sum(t, axis=1)                  # (tb,)
    neg_num = total - pos_num
    neg_cnt = n_classes - pos_cnt
    row_loss = pos_num / (pos_cnt + eps) + neg_num / (neg_cnt + eps)

    out_ref[...] = row_loss[None, :]              # lane-dense (1, tb) store


def _chip_limits():
    """(physical VMEM bytes, #TensorCores per chip) with safe fallbacks."""
    vmem_phys = 128 * 1024 * 1024
    num_tc = 1
    try:
        info = pltpu.get_tpu_info()
        vmem_phys = int(getattr(info, "vmem_capacity_bytes", vmem_phys))
    except Exception:
        pass
    try:
        kind = jax.devices()[0].device_kind.lower()
        # 2 TensorCores per chip: v7x, and megacore v4 / v5p.
        if ("v7" in kind) or ("v4" in kind) or ("v5p" in kind):
            num_tc = 2
        if "v7" in kind:
            vmem_phys = min(vmem_phys, 64 * 1024 * 1024)
    except Exception:
        pass
    return vmem_phys, num_tc


def _row_footprint_bytes(C, x_dtype, y_dtype):
    """Per-row VMEM footprint: double-buffered inputs + live f32 intermediates."""
    in_bytes = C * (jnp.dtype(x_dtype).itemsize + jnp.dtype(y_dtype).itemsize)
    tmp_bytes = 6 * C * 4   # upcast x & t, prob/loss, focal base/weight, reduce feeds
    return 2 * in_bytes + tmp_bytes


def _pick_row_tile(B, C, x_dtype, y_dtype, vmem_budget_bytes, num_tc):
    """Largest row tile whose full footprint (inputs + intermediates) fits."""
    bytes_per_row = max(1, _row_footprint_bytes(C, x_dtype, y_dtype))
    tb = int(vmem_budget_bytes // bytes_per_row)
    tb = max(1, min(tb, 2048))
    if num_tc > 1:
        # Keep >= 4 roughly equal grid steps so the batch axis shards over the
        # 2 TensorCores with decent load balance.  On single-TC chips we skip
        # this (it would only add ~0.35 us/step pipeline overhead).
        tb = min(tb, max(8, pl.cdiv(B, 4)))
    # Sublane alignment for the narrowest input dtype (8 f32 / 16 bf16 / 32 i8);
    # prefer a multiple of 128 so the per-row-loss output store is lane-dense.
    sublane = max(32 // jnp.dtype(x_dtype).itemsize,
                  32 // jnp.dtype(y_dtype).itemsize)
    if tb >= 128:
        tb -= tb % 128
    elif tb >= sublane:
        tb -= tb % sublane
    else:
        tb = sublane
    return max(1, min(tb, B))


def asymmetric_loss_scaled(x, y, *, gamma_neg=4, gamma_pos=1, clip=0.05,
                           eps=1e-8, reduce="mean", binary_targets=True,
                           row_tile=None, vmem_budget_bytes=None):
    """JAX/Pallas equivalent of AsymmetricLossScaled.forward(x, y).

    y may be float32 / bfloat16 / int8 / bool; it is upcast to f32 inside the
    kernel (narrow dtypes cut HBM read traffic).  `binary_targets=True`
    (default, matching the module's "multi-label binarized vector" contract)
    enables the single-log / select fast path; pass False for soft labels.
    """
    # TODO(synk): forward-only; training use under jax.grad needs a custom_vjp
    # (pallas_call has no autodiff rule).
    assert x.shape == y.shape and x.ndim == 2
    B, C = x.shape

    vmem_phys, num_tc = _chip_limits()
    if vmem_budget_bytes is None:
        # ~half of physical minus headroom: ~24 MiB on v7x, ~56 MiB on v5e/v6e.
        vmem_budget_bytes = min(max(vmem_phys // 2 - (8 << 20), 16 << 20), 56 << 20)

    if row_tile is None:
        tb = _pick_row_tile(B, C, x.dtype, y.dtype, vmem_budget_bytes, num_tc)
    else:
        tb = max(1, min(int(row_tile), B))
    num_tiles = pl.cdiv(B, tb)

    # Scoped-VMEM limit derived from the actual per-tile footprint, capped
    # safely below physical (~40 MiB on v7x's 64 MiB, larger on 128-MiB chips).
    footprint = tb * _row_footprint_bytes(C, x.dtype, y.dtype) + (2 << 20)
    vmem_limit = int(min(vmem_phys - (8 << 20),
                         max(footprint, vmem_budget_bytes) + (16 << 20)))

    kernel = functools.partial(
        _asl_row_kernel,
        gamma_neg=float(gamma_neg), gamma_pos=float(gamma_pos),
        clip=float(clip), eps=float(eps), n_classes=float(C),
        binary_targets=bool(binary_targets),
    )

    # Per-row losses, emitted lane-dense as (num_tiles, tb), flattened below.
    # (Ragged last tile: padded input rows produce garbage rows that are
    # sliced off after the reshape.)
    row_loss = pl.pallas_call(
        kernel,
        out_shape=jax.ShapeDtypeStruct((num_tiles, tb), jnp.float32),
        grid=(num_tiles,),
        in_specs=[
            pl.BlockSpec((tb, C), lambda i: (i, 0)),
            pl.BlockSpec((tb, C), lambda i: (i, 0)),
        ],
        out_specs=pl.BlockSpec((1, tb), lambda i: (i, 0)),
        compiler_params=pltpu.CompilerParams(
            dimension_semantics=("parallel",),
            vmem_limit_bytes=vmem_limit,
        ),
    )(x, y)

    loss = row_loss.reshape(-1)[:B]               # per-batch-row loss
    # With eps clamps on both log arguments NaNs essentially never occur; if
    # every row were NaN the mean divides by zero (matches torch's behavior).
    valid = jnp.logical_not(jnp.isnan(loss))      # ~loss.isnan()
    neg = jnp.where(valid, -loss, 0.0)
    if reduce == "mean":
        return jnp.sum(neg) / jnp.sum(valid)      # mean over non-NaN rows
    elif reduce == "sum":
        return jnp.sum(neg)
    else:
        # TODO(synk): reduce='none' in PyTorch returns a dynamically shaped
        # NaN-filtered vector; no jittable equivalent, so return the masked
        # (zero at NaN rows) fixed-shape per-row vector instead.
        return neg


def _reference(x, y, gamma_neg=4, gamma_pos=1, clip=0.05, eps=1e-8):
    """Plain-JAX mirror of the PyTorch forward (for correctness checking)."""
    y = y.astype(jnp.float32)
    x = x.astype(jnp.float32)
    xs_pos = jax.nn.sigmoid(x)
    xs_neg = jnp.minimum(1.0 - xs_pos + clip, 1.0)
    loss = y * jnp.log(jnp.maximum(xs_pos, eps))
    loss = loss + (1.0 - y) * jnp.log(jnp.maximum(xs_neg, eps))
    if gamma_neg > 0 or gamma_pos > 0:
        w = jnp.power(1.0 - xs_pos * y - xs_neg * (1.0 - y),
                      gamma_pos * y + gamma_neg * (1.0 - y))
        loss = loss * w
    pos = jnp.sum(y * loss, axis=1) / (jnp.sum(y, axis=1) + eps)
    neg = jnp.sum((1.0 - y) * loss, axis=1) / (jnp.sum(1.0 - y, axis=1) + eps)
    per_row = -(pos + neg)
    valid = jnp.logical_not(jnp.isnan(per_row))
    return jnp.sum(jnp.where(valid, per_row, 0.0)) / jnp.sum(valid)


if __name__ == "__main__":
    key = jax.random.PRNGKey(0)
    kx, ky = jax.random.split(key)

    B, C = 128, 256
    x = jax.random.normal(kx, (B, C), dtype=jnp.float32)
    y_f32 = (jax.random.uniform(ky, (B, C)) < 0.3).astype(jnp.float32)
    y_i8 = y_f32.astype(jnp.int8)          # narrow-dtype targets
    x_bf16 = x.astype(jnp.bfloat16)        # narrow-dtype logits

    out = asymmetric_loss_scaled(x, y_f32)
    out_i8 = asymmetric_loss_scaled(x, y_i8)
    out_bf16 = asymmetric_loss_scaled(x_bf16, y_i8)
    jax.block_until_ready((out, out_i8, out_bf16))

    ref = _reference(x, y_f32)
    ref_bf16 = _reference(x_bf16.astype(jnp.float32), y_f32)
    assert out.shape == () and out.dtype == jnp.float32
    assert jnp.allclose(out, ref, rtol=1e-4, atol=1e-5), (out, ref)
    assert jnp.allclose(out_i8, ref, rtol=1e-4, atol=1e-5), (out_i8, ref)
    assert jnp.allclose(out_bf16, ref_bf16, rtol=1e-3, atol=1e-4), (out_bf16, ref_bf16)

    # Odd shapes + soft (non-binary) targets exercise the general blended path.
    B2, C2 = 9, 40
    k1, k2 = jax.random.split(ky)
    x2 = jax.random.normal(k1, (B2, C2), dtype=jnp.float32)
    y2 = jnp.where(jax.random.uniform(k2, (B2, C2)) < 0.3, 0.9, 0.1).astype(jnp.float32)
    out2 = asymmetric_loss_scaled(x2, y2, binary_targets=False)
    jax.block_until_ready(out2)
    ref2 = _reference(x2, y2)
    assert jnp.allclose(out2, ref2, rtol=1e-4, atol=1e-5), (out2, ref2)

    print("KERNEL_OK")
</pallas_src>

<mosaic_0001>
module attributes {stable_mosaic.version = 11 : i64} {
  func.func @_asl_row_kernel(%arg0: i32, %arg1: memref<128x256xf32, #tpu.memory_space<vmem>>, %arg2: memref<128x256xf32, #tpu.memory_space<vmem>>, %arg3: memref<1x128xf32, #tpu.memory_space<vmem>>) attributes {dimension_semantics = [#tpu.dimension_semantics<parallel>], iteration_bounds = array<i64: 1>, scalar_prefetch = 0 : i64, scratch_operands = 0 : i64, tpu.core_type = #tpu.core_type<tc>, window_params = [{transform_indices = @transform_0, window_bounds = array<i64: 128, 256>}, {transform_indices = @transform_1, window_bounds = array<i64: 128, 256>}, {transform_indices = @transform_2, window_bounds = array<i64: 1, 128>}]} {
    %c0 = arith.constant 0 : index
    %c0_0 = arith.constant 0 : index
    %0 = vector.load %arg1[%c0, %c0_0] : memref<128x256xf32, #tpu.memory_space<vmem>>, vector<128x256xf32>
    %c0_1 = arith.constant 0 : index
    %c0_2 = arith.constant 0 : index
    %1 = vector.load %arg2[%c0_1, %c0_2] : memref<128x256xf32, #tpu.memory_space<vmem>>, vector<128x256xf32>
    %cst = arith.constant 5.000000e-01 : f32
    %2 = vector.broadcast %cst : f32 to vector<128x256xf32>
    %3 = arith.mulf %2, %0 : vector<128x256xf32>
    %4 = math.tanh %3 : vector<128x256xf32>
    %cst_3 = arith.constant 5.000000e-01 : f32
    %5 = vector.broadcast %cst_3 : f32 to vector<128x256xf32>
    %6 = arith.mulf %5, %4 : vector<128x256xf32>
    %cst_4 = arith.constant 5.000000e-01 : f32
    %7 = vector.broadcast %cst_4 : f32 to vector<128x256xf32>
    %8 = arith.addf %6, %7 : vector<128x256xf32>
    %cst_5 = arith.constant 1.000000e+00 : f32
    %9 = vector.broadcast %cst_5 : f32 to vector<128x256xf32>
    %10 = arith.subf %9, %8 : vector<128x256xf32>
    %cst_6 = arith.constant 5.000000e-02 : f32
    %11 = vector.broadcast %cst_6 : f32 to vector<128x256xf32>
    %12 = arith.addf %10, %11 : vector<128x256xf32>
    %cst_7 = arith.constant 1.000000e+00 : f32
    %13 = vector.broadcast %cst_7 : f32 to vector<128x256xf32>
    %14 = arith.minimumf %12, %13 : vector<128x256xf32>
    %cst_8 = arith.constant 5.000000e-01 : f32
    %15 = vector.broadcast %cst_8 : f32 to vector<128x256xf32>
    %16 = arith.cmpf ogt, %1, %15 : vector<128x256xf32>
    %cst_9 = arith.constant 9.99999993E-9 : f32
    %17 = vector.broadcast %cst_9 : f32 to vector<128x256xf32>
    %18 = arith.maximumf %8, %17 : vector<128x256xf32>
    %19 = arith.select %16, %18, %14 : vector<128x256xi1>, vector<128x256xf32>
    %20 = math.log %19 : vector<128x256xf32>
    %cst_10 = arith.constant 1.000000e+00 : f32
    %21 = vector.broadcast %cst_10 : f32 to vector<128x256xf32>
    %22 = arith.subf %21, %8 : vector<128x256xf32>
    %cst_11 = arith.constant 1.000000e+00 : f32
    %23 = vector.broadcast %cst_11 : f32 to vector<128x256xf32>
    %24 = arith.subf %23, %14 : vector<128x256xf32>
    %25 = arith.select %16, %22, %24 : vector<128x256xi1>, vector<128x256xf32>
    %26 = arith.mulf %25, %25 : vector<128x256xf32>
    %27 = arith.mulf %26, %26 : vector<128x256xf32>
    %28 = arith.select %16, %25, %27 : vector<128x256xi1>, vector<128x256xf32>
    %29 = arith.mulf %20, %28 : vector<128x256xf32>
    %cst_12 = arith.constant 0.000000e+00 : f32
    %30 = vector.broadcast %cst_12 : f32 to vector<128x256xf32>
    %31 = arith.select %16, %29, %30 : vector<128x256xi1>, vector<128x256xf32>
    %cst_13 = arith.constant dense<0.000000e+00> : vector<128xf32>
    %32 = vector.multi_reduction <add>, %31, %cst_13 [1] : vector<128x256xf32> to vector<128xf32>
    %cst_14 = arith.constant dense<0.000000e+00> : vector<128xf32>
    %33 = vector.multi_reduction <add>, %29, %cst_14 [1] : vector<128x256xf32> to vector<128xf32>
    %cst_15 = arith.constant dense<0.000000e+00> : vector<128xf32>
    %34 = vector.multi_reduction <add>, %1, %cst_15 [1] : vector<128x256xf32> to vector<128xf32>
    %35 = arith.subf %33, %32 : vector<128xf32>
    %cst_16 = arith.constant 2.560000e+02 : f32
    %36 = vector.broadcast %cst_16 : f32 to vector<128xf32>
    %37 = arith.subf %36, %34 : vector<128xf32>
    %cst_17 = arith.constant 9.99999993E-9 : f32
    %38 = vector.broadcast %cst_17 : f32 to vector<128xf32>
    %39 = arith.addf %34, %38 : vector<128xf32>
    %40 = arith.divf %32, %39 : vector<128xf32>
    %cst_18 = arith.constant 9.99999993E-9 : f32
    %41 = vector.broadcast %cst_18 : f32 to vector<128xf32>
    %42 = arith.addf %37, %41 : vector<128xf32>
    %43 = arith.divf %35, %42 : vector<128xf32>
    %44 = arith.addf %40, %43 : vector<128xf32>
    %45 = vector.shape_cast %44 : vector<128xf32> to vector<1x128xf32>
    %c0_19 = arith.constant 0 : index
    %c0_20 = arith.constant 0 : index
    %46 = vector.load %arg3[%c0_19, %c0_20] : memref<1x128xf32, #tpu.memory_space<vmem>>, vector<1x128xf32>
    tpu.vector_store %arg3[%c0_19, %c0_20], %45 {strides = array<i32>} : memref<1x128xf32, #tpu.memory_space<vmem>>, vector<1x128xf32>,
    return
  }
  func.func @transform_0(%arg0: i32) -> (i32, i32) {
    %c0_i32 = arith.constant 0 : i32
    %c0_i32_0 = arith.constant 0 : i32
    return %arg0, %c0_i32 : i32, i32
  }
  func.func @transform_1(%arg0: i32) -> (i32, i32) {
    %c0_i32 = arith.constant 0 : i32
    %c0_i32_0 = arith.constant 0 : i32
    return %arg0, %c0_i32 : i32, i32
  }
  func.func @transform_2(%arg0: i32) -> (i32, i32) {
    %c0_i32 = arith.constant 0 : i32
    %c0_i32_0 = arith.constant 0 : i32
    return %arg0, %c0_i32 : i32, i32
  }
}

</mosaic_0001>

<bundles_post_ra>
// kernel: tpu_custom_call.1
= control target key start
LH: loop header
LB: loop body
LE: loop exit
PB: predicated region body
PF: predicated region fallthrough
CT: control target
= control target key end

     0   :  { %7 = vsyncpa [#allocation3], 0  ;;  %s2416_s0 = inlined_call_operand.hbm [shape: f32[128,256], index: 0, kind: input, shape index: {}]   ;;  %s2417_s1 = inlined_call_operand.hbm [shape: f32[128,256], index: 1, kind: input, shape index: {}]   ;;  %s2418_s2 = inlined_call_operand.hbm [shape: f32[1,128], index: 2, kind: output, shape index: {}]  }
   0x1   :  { %8 = vsyncpa [#allocation6], 0 }
   0x2   :  { %9 = vsyncpa [#allocation4], 0  ;;  %s1408_s9 = smov [#allocation2]  }
   0x3   :  { %s15_s10 = sshll.u32 %s1408_s9, 4  ;;  %s16_s10 = int_to_ptr.vmem [resolvable:$true] %s15_s10 }
   0x4   :  { %s1350_s11 = scalar_lea.vmem %s16_s10, 4096  ;;  %p1355_p1 = scmp.lt.s32.totalorder %s16_s10, %s16_s10 }
   0x5   :  { %p1351_p0 = scmp.ne.s32.totalorder %s16_s10, %s1350_s11  ;;  %p1356_p2 = scmp.lt.s32.totalorder %s1350_s11, %s1350_s11 }
   0x7   :  { %p1357_p3 = por %p1356_p2, %p1355_p1 }
   0x9   :  { %p1358_p4 = pnand %p1357_p3, %p1351_p0 }
   0xb   :  { %1361 = shalt.err (!%p1358_p4)
}
   0xc   :  { %s1409_s12 = smov 256   ;;  %s1410_s13 = smov 16  }
   0xd   :  { %21 = dma.hbm_to_vmem [thread:$0]  %s2416_s0, 4096, %s16_s10, [#allocation3], %s1409_s12, %s1409_s12, %s1410_s13  }
   0xe   :  { %s1411_s16 = smov [#allocation5]  }
   0xf   :  { %s27_s17 = sshll.u32 %s1411_s16, 4  ;;  %s28_s17 = int_to_ptr.vmem [resolvable:$true] %s27_s17 }
  0x10   :  { %s1370_s18 = scalar_lea.vmem %s28_s17, 4096  ;;  %p1375_p6 = scmp.lt.s32.totalorder %s28_s17, %s28_s17 }
  0x11   :  { %p1371_p5 = scmp.ne.s32.totalorder %s28_s17, %s1370_s18  ;;  %p1376_p7 = scmp.lt.s32.totalorder %s1370_s18, %s1370_s18 }
  0x13   :  { %p1377_p8 = por %p1376_p7, %p1375_p6 }
  0x15   :  { %p1378_p9 = pnand %p1377_p8, %p1371_p5 }
  0x17   :  { %1381 = shalt.err (!%p1378_p9)
}
  0x18   :  { %33 = dma.hbm_to_vmem [thread:$0]  %s2417_s1, 4096, %s28_s17, [#allocation6], %s1409_s12, %s1409_s12, %s1410_s13  }
  0x19   :  { %1402 = dma.done.wait [#allocation3], 4096  }
  0x1a   :  { %1403 = vsyncadd [#allocation3], 4294963200 }
  0x1b   :  { %1404 = dma.done.wait [#allocation6], 4096  }
  0x1c   :  { %1405 = vsyncadd [#allocation6], 4294963200  ;;  %v1434_v0 = vld [vmem:[#allocation5 + $0x20] sm:$0xff]  ;;  %v1436_v1 = vld [vmem:[#allocation5 + $0x28] sm:$0xff]  ;;  %s1412_s0 = smov [#allocation7]  }
  0x1d   :  { %2500 = vst [vmem:[#allocation11_spill] sm:$0xff] %v1434_v0  ;;  %2501 = vst [vmem:[#allocation12_spill] sm:$0xff] %v1436_v1  ;;  %v44_v2 = vld [vmem:[#allocation2 + $0x20] sm:$0xff]  ;;  %v814_v3 = vadd.f32 %v1436_v1, %v1434_v0  ;;  %v45_v4 = vld [vmem:[#allocation2 + $0x28] sm:$0xff]  ;;  %vm332_vm0 = vcmp.gt.f32.partialorder %v1434_v0, 0.5  ;;  %vm333_vm1 = vcmp.gt.f32.partialorder %v1436_v1, 0.5 }
  0x1e   :  { %v108_v5 = vmul.f32 0.5, %v44_v2  ;;  %v1440_v6 = vld [vmem:[#allocation5] sm:$0xff]  ;;  %v1442_v7 = vld [vmem:[#allocation5 + $0x8] sm:$0xff]  ;;  %v109_v8 = vmul.f32 0.5, %v45_v4  ;;  %v1446_v12 = vld [vmem:[#allocation5 + $0x30] sm:$0xff]  ;;  %s1135_s1 = sshll.u32 %s1412_s0, 4  ;;  %s1136_s1 = int_to_ptr.vmem [resolvable:$true] %s1135_s1 }
  0x1f   :  { %2502 = vst [vmem:[#allocation13_spill] sm:$0xff] %v1442_v7  ;;  %v808_v9 = vadd.f32 %v1442_v7, %v1440_v6  ;;  %v40_v10 = vld [vmem:[#allocation2] sm:$0xff]  ;;  %v41_v11 = vld [vmem:[#allocation2 + $0x8] sm:$0xff]  ;;  %2503 = vst [vmem:[#allocation14_spill] sm:$0xff] %v1446_v12  ;;  %815 = vadd.xlane.f32.xlu1 %v814_v3  ;;  %vm328_vm2 = vcmp.gt.f32.partialorder %v1440_v6, 0.5  ;;  %vm329_vm3 = vcmp.gt.f32.partialorder %v1442_v7, 0.5  ;;  %p1387_p11 = scmp.lt.s32.totalorder %s1136_s1, %s1136_s1 }
  0x20   :  { %1150 = vtanh.f32 %v108_v5  ;;  %v104_v13 = vmul.f32 0.5, %v40_v10  ;;  %v105_v14 = vmul.f32 0.5, %v41_v11  ;;  %v1448_v15 = vld [vmem:[#allocation5 + $0x38] sm:$0xff]  ;;  %v46_v16 = vld [vmem:[#allocation2 + $0x30] sm:$0xff]  ;;  %v1462_v27 = vld [vmem:[#allocation5 + $0x40] sm:$0xff]  ;;  %vm334_vm4 = vcmp.gt.f32.partialorder %v1446_v12, 0.5 }
  0x21   :  { %2504 = vst [vmem:[#allocation15_spill] sm:$0xff] %v1448_v15  ;;  %v47_v17 = vld [vmem:[#allocation2 + $0x38] sm:$0xff]  ;;  %1152 = vtanh.f32 %v109_v8  ;;  %809 = vadd.xlane.f32.xlu0 %v808_v9  ;;  %v817_v18 = vadd.f32 %v1448_v15, %v1446_v12  ;;  %v110_v19 = vmul.f32 0.5, %v46_v16  ;;  %v1452_v20 = vld [vmem:[#allocation5 + $0x10] sm:$0xff]  ;;  %v1466_v30 = vld [vmem:[#allocation5 + $0x48] sm:$0xff]  ;;  %vm335_vm5 = vcmp.gt.f32.partialorder %v1448_v15, 0.5 }
  0x22   :  { %v1454_v21 = vld [vmem:[#allocation5 + $0x18] sm:$0xff]  ;;  %1154 = vtanh.f32 %v104_v13  ;;  %v111_v22 = vmul.f32 0.5, %v47_v17  ;;  %v1456_v23 = vld [vmem:[#allocation5 + $0x50] sm:$0xff]  ;;  %v820_v36 = vadd.f32 %v1466_v30, %v1462_v27  ;;  %v1474_v37 = vld [vmem:[#allocation5 + $0x60] sm:$0xff]  ;;  %vm2470_vm6 = vcmp.gt.f32.partialorder %v1452_v20, 0.5  ;;  %s1382_s21 = scalar_lea.vmem %s1136_s1, 16 }
  0x23   :  { %2505 = vst [vmem:[#allocation16_spill] sm:$0xff] %v1456_v23  ;;  %v1458_v24 = vld [vmem:[#allocation5 + $0x58] sm:$0xff]  ;;  %1156 = vtanh.f32 %v105_v14  ;;  %v811_v25 = vadd.f32 %v1454_v21, %v1452_v20  ;;  %v42_v26 = vld [vmem:[#allocation2 + $0x10] sm:$0xff]  ;;  %818 = vadd.xlane.f32.xlu1 %v817_v18  ;;  %2509 = vst [vmem:[#allocation20_spill] sm:$0xff] %v1474_v37  ;;  %vm2469_vm7 = vcmp.gt.f32.partialorder %v1454_v21, 0.5  ;;  %vm2435_vm8 = vcmp.gt.f32.partialorder %v1456_v23, 0.5  ;;  %p1383_p10 = scmp.ne.s32.totalorder %s1136_s1, %s1382_s21 }
  0x24   :  { %2506 = vst [vmem:[#allocation17_spill] sm:$0xff] %v1458_v24  ;;  %1158 = vtanh.f32 %v110_v19  ;;  %v43_v28 = vld [vmem:[#allocation2 + $0x18] sm:$0xff]  ;;  %v823_v29 = vadd.f32 %v1458_v24, %v1456_v23  ;;  %v50_v31 = vld [vmem:[#allocation2 + $0x50] sm:$0xff]  ;;  %v106_v34 = vmul.f32 0.5, %v42_v26  ;;  %v1476_v38 = vld [vmem:[#allocation5 + $0x68] sm:$0xff]  ;;  %vm2434_vm9 = vcmp.gt.f32.partialorder %v1458_v24, 0.5 }
  0x25   :  { %1160 = vtanh.f32 %v111_v22  ;;  %812 = vadd.xlane.f32.xlu0 %v811_v25  ;;  %v1468_v32 = vld [vmem:[#allocation5 + $0x70] sm:$0xff]  ;;  %v1470_v33 = vld [vmem:[#allocation5 + $0x78] sm:$0xff]  ;;  %2510 = vst [vmem:[#allocation21_spill] sm:$0xff] %v1476_v38  ;;  %v107_v39 = vmul.f32 0.5, %v43_v28  ;;  %v48_v40 = vld [vmem:[#allocation2 + $0x40] sm:$0xff]  ;;  %v114_v41 = vmul.f32 0.5, %v50_v31  ;;  %v826_v45 = vadd.f32 %v1476_v38, %v1474_v37 }
  0x26   :  { %2507 = vst [vmem:[#allocation18_spill] sm:$0xff] %v1468_v32  ;;  %2508 = vst [vmem:[#allocation19_spill] sm:$0xff] %v1470_v33  ;;  %v51_v35 = vld [vmem:[#allocation2 + $0x58] sm:$0xff]  ;;  %v49_v42 = vld [vmem:[#allocation2 + $0x48] sm:$0xff]  ;;  %v829_v43 = vadd.f32 %v1470_v33, %v1468_v32  ;;  %1162 = vtanh.f32 %v106_v34  ;;  %v112_v48 = vmul.f32 0.5, %v48_v40  ;;  %vm336_vm10 = vcmp.gt.f32.partialorder %v1462_v27, 0.5 }
  0x27   :  { %824 = vadd.xlane.f32.xlu1 %v823_v29  ;;  %v115_v44 = vmul.f32 0.5, %v51_v35  ;;  %v1482_v46 = vld [vmem:[#allocation5 + $0x90] sm:$0xff]  ;;  %v1484_v47 = vld [vmem:[#allocation5 + $0x98] sm:$0xff]  ;;  %v1486_v50 = vld [vmem:[#allocation5 + $0x80] sm:$0xff]  ;;  %1164 = vtanh.f32 %v107_v39  ;;  %v113_v52 = vmul.f32 0.5, %v49_v42  ;;  %vm337_vm11 = vcmp.gt.f32.partialorder %v1466_v30, 0.5 }
  0x28   :  { %2511 = vst [vmem:[#allocation22_spill] sm:$0xff] %v1482_v46  ;;  %2512 = vst [vmem:[#allocation23_spill] sm:$0xff] %v1484_v47  ;;  %v54_v49 = vld [vmem:[#allocation2 + $0x70] sm:$0xff]  ;;  %v1488_v51 = vld [vmem:[#allocation5 + $0x88] sm:$0xff]  ;;  %1166 = vtanh.f32 %v114_v41  ;;  %v835_v56 = vadd.f32 %v1484_v47, %v1482_v46  ;;  %vm2449_vm12 = vcmp.gt.f32.partialorder %v1468_v32, 0.5  ;;  %vm2448_vm13 = vcmp.gt.f32.partialorder %v1470_v33, 0.5 }
  0x29   :  { %821 = vadd.xlane.f32.xlu0 %v820_v36  ;;  %2513 = vst [vmem:[#allocation24_spill] sm:$0xff] %v1486_v50  ;;  %2514 = vst [vmem:[#allocation25_spill] sm:$0xff] %v1488_v51  ;;  %v55_v53 = vld [vmem:[#allocation2 + $0x78] sm:$0xff]  ;;  %v52_v54 = vld [vmem:[#allocation2 + $0x60] sm:$0xff]  ;;  %1168 = vtanh.f32 %v115_v44  ;;  %v118_v58 = vmul.f32 0.5, %v54_v49  ;;  %v832_v60 = vadd.f32 %v1488_v51, %v1486_v50  ;;  %vm340_vm14 = vcmp.gt.f32.partialorder %v1474_v37, 0.5 }
  0x2a   :  { %v53_v55 = vld [vmem:[#allocation2 + $0x68] sm:$0xff]  ;;  %v58_v59 = vld [vmem:[#allocation2 + $0x90] sm:$0xff]  ;;  %v1496_v62 = vld [vmem:[#allocation5 + $0xb8] sm:$0xff]  ;;  %1170 = vtanh.f32 %v112_v48  ;;  %v119_v3 = vmul.f32 0.5, %v55_v53  ;;  %v116_v9 = vmul.f32 0.5, %v52_v54  ;;  %vm341_vm15 = vcmp.gt.f32.partialorder %v1476_v38, 0.5 }
  0x2b   :  { %830 = vadd.xlane.f32.xlu1 %v829_v43  ;;  %v1494_v61 = vld [vmem:[#allocation5 + $0xb0] sm:$0xff]  ;;  %2516 = vst [vmem:[#allocation27_spill] sm:$0xff] %v1496_v62  ;;  %v59_v4 = vld [vmem:[#allocation2 + $0x98] sm:$0xff]  ;;  %1172 = vtanh.f32 %v113_v52  ;;  %v117_v10 = vmul.f32 0.5, %v53_v55  ;;  %v122_v16 = vmul.f32 0.5, %v58_v59  ;;  %v56_v17 = vld [vmem:[#allocation2 + $0x80] sm:$0xff] }
  0x2c   :  { %2515 = vst [vmem:[#allocation26_spill] sm:$0xff] %v1494_v61  ;;  %v841_v18 = vadd.f32 %v1496_v62, %v1494_v61  ;;  %1174 = vtanh.f32 %v118_v58  ;;  %v123_v26 = vmul.f32 0.5, %v59_v4  ;;  %v57_v28 = vld [vmem:[#allocation2 + $0x88] sm:$0xff]  ;;  %v1508_v41 = vmul.f32 0.5, %v56_v17  ;;  %v62_v53 = vld [vmem:[#allocation2 + $0xb0] sm:$0xff]  ;;  %s1386_s22 = scalar_lea.vmem %s1136_s1, 32 }
  0x2d   :  { %v1151_v57 = vpop.eup %1150  ;;  %827 = vadd.xlane.f32.xlu0 %v826_v45  ;;  %1176 = vtanh.f32 %v119_v3  ;;  %v1515_v45 = vmul.f32 0.5, %v57_v28  ;;  %p1388_p12 = scmp.lt.s32.totalorder %s1386_s22, %s1382_s21 }
  0x2e   :  { %v1153_v63 = vpop.eup %1152  ;;  %v172_v2 = vmul.f32 0.5, %v1151_v57  ;;  %1178 = vtanh.f32 %v116_v9  ;;  %v1528_v9 = vmul.f32 0.5, %v62_v53 }
  0x2f   :  { %v1155_v5 = vpop.eup %1154  ;;  %v173_v8 = vmul.f32 0.5, %v1153_v63  ;;  %836 = vadd.xlane.f32.xlu1 %v835_v56  ;;  %1180 = vtanh.f32 %v117_v10  ;;  %p1389_p13 = por %p1388_p12, %p1387_p11 }
  0x30   :  { %v1157_v11 = vpop.eup %1156  ;;  %v204_v13 = vadd.f32 0.5, %v172_v2  ;;  %v168_v14 = vmul.f32 0.5, %v1155_v5  ;;  %1182 = vtanh.f32 %v122_v16 }
  0x31   :  { %v1159_v19 = vpop.eup %1158  ;;  %v205_v22 = vadd.f32 0.5, %v173_v8  ;;  %v169_v25 = vmul.f32 0.5, %v1157_v11  ;;  %833 = vadd.xlane.f32.xlu0 %v832_v60  ;;  %v63_v8 = vld [vmem:[#allocation2 + $0xb8] sm:$0xff]  ;;  %1184 = vtanh.f32 %v123_v26  ;;  %p1390_p0 = pnand %p1389_p13, %p1383_p10 }
  0x32   :  { %v1161_v29 = vpop.eup %1160  ;;  %v1503_v31 = vsub.f32 1.0, %v204_v13  ;;  %v200_v34 = vadd.f32 0.5, %v168_v14  ;;  %v174_v35 = vmul.f32 0.5, %v1159_v19  ;;  %v364_v55 = vmax.f32 %v204_v13, 1e-08 }
  0x33   :  { %v1505_v36 = vsub.f32 1.0, %v205_v22  ;;  %v201_v39 = vadd.f32 0.5, %v169_v25  ;;  %v175_v40 = vmul.f32 0.5, %v1161_v29  ;;  %842 = vadd.xlane.f32.xlu1 %v841_v18  ;;  %v1163_v58 = vpop.eup %1162  ;;  %v365_v60 = vmax.f32 %v205_v22, 1e-08 }
  0x34   :  { %2517 = vst [vmem:[#allocation28_spill] sm:$0xff] %v1503_v31  ;;  %v268_v42 = vadd.f32 0.05, %v1503_v31  ;;  %v1511_v43 = vsub.f32 1.0, %v200_v34  ;;  %v1513_v44 = vadd.f32 0.5, %v174_v35  ;;  %v1165_v2 = vpop.eup %1164  ;;  %v1542_v35 = vmul.f32 0.5, %v63_v8 }
  0x35   :  { %2518 = vst [vmem:[#allocation29_spill] sm:$0xff] %v1505_v36  ;;  %v269_v48 = vadd.f32 0.05, %v1505_v36  ;;  %v1518_v49 = vsub.f32 1.0, %v201_v39  ;;  %v1520_v52 = vadd.f32 0.5, %v175_v40  ;;  %v1167_v11 = vpop.eup %1166 }
  0x36   :  { %v300_v54 = vmin.f32 %v268_v42, 1.0  ;;  %v264_v56 = vadd.f32 0.05, %v1511_v43  ;;  %v1525_v57 = vsub.f32 1.0, %v1513_v44  ;;  %v360_v5 = vmax.f32 %v200_v34, 1e-08  ;;  %v1169_v18 = vpop.eup %1168 }
  0x37   :  { %2519 = vst [vmem:[#allocation30_spill] sm:$0xff] %v1518_v49  ;;  %v301_v59 = vmin.f32 %v269_v48, 1.0  ;;  %v265_v63 = vadd.f32 0.05, %v1518_v49  ;;  %v1531_v14 = vsub.f32 1.0, %v1520_v52  ;;  %v1171_v28 = vpop.eup %1170 }
  0x38   :  { %2520 = vst [vmem:[#allocation31_spill] sm:$0xff] %v1525_v57  ;;  %v492_v3 = vsub.f32 1.0, %v300_v54  ;;  %v296_v4 = vmin.f32 %v264_v56, 1.0  ;;  %v270_v17 = vadd.f32 0.05, %v1525_v57  ;;  %v396_v19 = vsel %vm332_vm0, %v364_v55, %v300_v54  ;;  %v1173_v16 = vpop.eup %1172 }
  0x39   :  { %v493_v13 = vsub.f32 1.0, %v301_v59  ;;  %2521 = vst [vmem:[#allocation32_spill] sm:$0xff] %v1531_v14  ;;  %v297_v10 = vmin.f32 %v265_v63, 1.0  ;;  %v361_v22 = vmax.f32 %v201_v39, 1e-08  ;;  %v397_v29 = vsel %vm333_vm1, %v365_v60, %v301_v59  ;;  %v1554_v55 = vpop.eup %1174 }
  0x3a   :  { %v488_v25 = vsub.f32 1.0, %v296_v4  ;;  %v524_v34 = vsel %vm332_vm0, %v1503_v31, %v492_v3  ;;  %v392_v39 = vsel %vm328_vm2, %v360_v5, %v296_v4  ;;  %1186 = vlog2.f32 %v396_v19  ;;  %v1558_v63 = vpop.eup %1176 }
  0x3b   :  { %v525_v40 = vsel %vm333_vm1, %v1505_v36, %v493_v13  ;;  %v489_v42 = vsub.f32 1.0, %v297_v10  ;;  %v271_v53 = vadd.f32 0.05, %v1531_v14  ;;  %v302_v54 = vmin.f32 %v270_v17, 1.0 }
  0x3c   :  { %v520_v48 = vsel %vm328_vm2, %v1511_v43, %v488_v25  ;;  %v366_v26 = vmax.f32 %v1513_v44, 1e-08  ;;  %1188 = vlog2.f32 %v397_v29  ;;  %v393_v56 = vsel %vm329_vm3, %v361_v22, %v297_v10  ;;  %v1568_v10 = vpop.eup %1178 }
  0x3d   :  { %v170_v59 = vmul.f32 0.5, %v1163_v58  ;;  %v171_v60 = vmul.f32 0.5, %v1165_v2  ;;  %v556_v3 = vmul.f32 %v524_v34, %v524_v34  ;;  %v557_v4 = vmul.f32 %v525_v40, %v525_v40 }
  0x3e   :  { %1190 = vlog2.f32 %v392_v39  ;;  %v552_v5 = vmul.f32 %v520_v48, %v520_v48  ;;  %v521_v8 = vsel %vm329_vm3, %v1518_v49, %v489_v42  ;;  %v303_v13 = vmin.f32 %v271_v53, 1.0  ;;  %v1580_v48 = vpop.eup %1180 }
  0x3f   :  { %v202_v44 = vadd.f32 0.5, %v170_v59  ;;  %v203_v17 = vadd.f32 0.5, %v171_v60  ;;  %1192 = vlog2.f32 %v393_v56  ;;  %v367_v19 = vmax.f32 %v1520_v52, 1e-08 }
  0x40   :  { %v398_v58 = vsel %vm334_vm4, %v366_v26, %v302_v54  ;;  %v178_v2 = vmul.f32 0.5, %v1167_v11  ;;  %v494_v22 = vsub.f32 1.0, %v302_v54  ;;  %v495_v25 = vsub.f32 1.0, %v303_v13 }
  0x41   :  { %v1570_v29 = vsub.f32 1.0, %v202_v44  ;;  %v1572_v34 = vsub.f32 1.0, %v203_v17  ;;  %v1574_v40 = vmul.f32 %v556_v3, %v556_v3  ;;  %v1576_v39 = vmul.f32 %v557_v4, %v557_v4  ;;  %v1588_v3 = vpop.eup %1182 }
  0x42   :  { %v553_v42 = vmul.f32 %v521_v8, %v521_v8  ;;  %v1578_v52 = vmul.f32 %v552_v5, %v552_v5  ;;  %1194 = vlog2.f32 %v398_v58  ;;  %v179_v54 = vmul.f32 0.5, %v1169_v18 }
  0x43   :  { %2522 = vst [vmem:[#allocation33_spill] sm:$0xff] %v1574_v40  ;;  %2523 = vst [vmem:[#allocation34_spill] sm:$0xff] %v1576_v39  ;;  %v266_v11 = vadd.f32 0.05, %v1570_v29  ;;  %v267_v53 = vadd.f32 0.05, %v1572_v34  ;;  %v399_v26 = vsel %vm335_vm5, %v367_v19, %v303_v13  ;;  %v526_v4 = vsel %vm334_vm4, %v1525_v57, %v494_v22 }
  0x44   :  { %v210_v56 = vadd.f32 0.5, %v178_v2  ;;  %v176_v59 = vmul.f32 0.5, %v1171_v28  ;;  %v177_v60 = vmul.f32 0.5, %v1173_v16  ;;  %v527_v5 = vsel %vm335_vm5, %v1531_v14, %v495_v25  ;;  %v1599_v16 = vpop.eup %1184 }
  0x45   :  { %v298_v8 = vmin.f32 %v266_v11, 1.0  ;;  %v211_v18 = vadd.f32 0.5, %v179_v54  ;;  %v299_v13 = vmin.f32 %v267_v53, 1.0  ;;  %v362_v19 = vmax.f32 %v202_v44, 1e-08 }
  0x46   :  { %v1597_v58 = vsub.f32 1.0, %v210_v56  ;;  %v208_v28 = vadd.f32 0.5, %v176_v59  ;;  %v1601_v2 = vmul.f32 %v553_v42, %v553_v42  ;;  %v363_v1 = vmax.f32 %v203_v17, 1e-08 }
  0x47   :  { %v490_v12 = vsub.f32 1.0, %v298_v8  ;;  %v209_v22 = vadd.f32 0.5, %v177_v60  ;;  %1196 = vlog2.f32 %v399_v26  ;;  %v491_v25 = vsub.f32 1.0, %v299_v13  ;;  %v1607_v53 = vpop.eup %1186 }
  0x48   :  { %2524 = vst [vmem:[#allocation35_spill] sm:$0xff] %v1597_v58  ;;  %v1604_v11 = vsub.f32 1.0, %v211_v18  ;;  %v274_v54 = vadd.f32 0.05, %v1597_v58  ;;  %2526 = vst [vmem:[#allocation37_spill] sm:$0xff] %v1607_v53  ;;  %v558_v44 = vmul.f32 %v526_v4, %v526_v4  ;;  %v559_v15 = vmul.f32 %v527_v5, %v527_v5 }
  0x49   :  { %v522_v42 = vsel %vm2470_vm6, %v1570_v29, %v490_v12  ;;  %v1612_v59 = vsub.f32 1.0, %v208_v28  ;;  %v1614_v17 = vpop.eup %1188  ;;  %v394_v26 = vsel %vm2470_vm6, %v362_v19, %v298_v8  ;;  %v370_v57 = vmax.f32 %v210_v56, 1e-08 }
  0x4a   :  { %2525 = vst [vmem:[#allocation36_spill] sm:$0xff] %v1604_v11  ;;  %2527 = vst [vmem:[#allocation38_spill] sm:$0xff] %v1614_v17  ;;  %v275_v60 = vadd.f32 0.05, %v1604_v11  ;;  %v306_v14 = vmin.f32 %v274_v54, 1.0  ;;  %v395_v4 = vsel %vm2469_vm7, %v363_v1, %v299_v13  ;;  %v1623_v39 = vsub.f32 1.0, %v209_v22 }
  0x4b   :  { %v1619_v36 = vpop.eup %1190  ;;  %v371_v5 = vmax.f32 %v211_v18, 1e-08  ;;  %v272_v12 = vadd.f32 0.05, %v1612_v59  ;;  %v523_v0 = vsel %vm2469_vm7, %v1572_v34, %v491_v25  ;;  %v554_v31 = vmul.f32 %v522_v42, %v522_v42 }
  0x4c   :  { %v307_v8 = vmin.f32 %v275_v60, 1.0  ;;  %v368_v19 = vmax.f32 %v208_v28, 1e-08  ;;  %v1629_v40 = vpop.eup %1192  ;;  %v498_v56 = vsub.f32 1.0, %v306_v14  ;;  %v273_v54 = vadd.f32 0.05, %v1623_v39 }
  0x4d   :  { %v304_v17 = vmin.f32 %v272_v12, 1.0  ;;  %v182_v1 = vmul.f32 0.5, %v1554_v55  ;;  %v402_v18 = vsel %vm2435_vm8, %v370_v57, %v306_v14  ;;  %v369_v53 = vmax.f32 %v209_v22, 1e-08 }
  0x4e   :  { %v499_v13 = vsub.f32 1.0, %v307_v8  ;;  %v183_v7 = vmul.f32 0.5, %v1558_v63  ;;  %1198 = vlog2.f32 %v394_v26  ;;  %v555_v25 = vmul.f32 %v523_v0, %v523_v0 }
  0x4f   :  { %v403_v28 = vsel %vm2434_vm9, %v371_v5, %v307_v8  ;;  %v305_v42 = vmin.f32 %v273_v54, 1.0  ;;  %v1638_v60 = vpop.eup %1194  ;;  %v1640_v49 = vmul.f32 %v558_v44, %v558_v44  ;;  %1200 = vlog2.f32 %v395_v4 }
  0x50   :  { %v530_v55 = vsel %vm2435_vm8, %v1597_v58, %v498_v56  ;;  %v400_v57 = vsel %vm336_vm10, %v368_v19, %v304_v17  ;;  %v1648_v14 = vmul.f32 %v559_v15, %v559_v15  ;;  %1202 = vlog2.f32 %v402_v18 }
  0x51   :  { %v531_v0 = vsel %vm2434_vm9, %v1604_v11, %v499_v13  ;;  %v214_v63 = vadd.f32 0.5, %v182_v1  ;;  %v1653_v22 = vmul.f32 %v554_v31, %v554_v31  ;;  %1204 = vlog2.f32 %v403_v28 }
  0x52   :  { %v401_v44 = vsel %vm337_vm11, %v369_v53, %v305_v42  ;;  %v215_v26 = vadd.f32 0.5, %v183_v7  ;;  %v1657_v4 = vmul.f32 %v555_v25, %v555_v25  ;;  %v562_v5 = vmul.f32 %v530_v55, %v530_v55 }
  0x53   :  { %1206 = vlog2.f32 %v400_v57  ;;  %v1660_v15 = vsub.f32 1.0, %v214_v63  ;;  %v563_v12 = vmul.f32 %v531_v0, %v531_v0  ;;  %v496_v8 = vsub.f32 1.0, %v304_v17 }
  0x54   :  { %v497_v19 = vsub.f32 1.0, %v305_v42  ;;  %v1662_v56 = vsub.f32 1.0, %v215_v26  ;;  %v1665_v31 = vpop.eup %1196  ;;  %1208 = vlog2.f32 %v401_v44  ;;  %v180_v53 = vmul.f32 0.5, %v1568_v10 }
  0x55   :  { %2528 = vst [vmem:[#allocation39_spill] sm:$0xff] %v1660_v15  ;;  %v278_v7 = vadd.f32 0.05, %v1660_v15  ;;  %v181_v54 = vmul.f32 0.5, %v1580_v48  ;;  %v374_v18 = vmax.f32 %v214_v63, 1e-08  ;;  %1210 = vtanh.f32 %v1508_v41 }
  0x56   :  { %2529 = vst [vmem:[#allocation40_spill] sm:$0xff] %v1662_v56  ;;  %v279_v1 = vadd.f32 0.05, %v1662_v56  ;;  %v186_v17 = vmul.f32 0.5, %v1588_v3  ;;  %v187_v13 = vmul.f32 0.5, %v1599_v16  ;;  %v212_v28 = vadd.f32 0.5, %v180_v53 }
  0x57   :  { %v310_v25 = vmin.f32 %v278_v7, 1.0  ;;  %v213_v42 = vadd.f32 0.5, %v181_v54  ;;  %vm2463_vm9 = vcmp.gt.f32.partialorder %v1482_v46, 0.5  ;;  %v1676_v55 = vmul.f32 %v562_v5, %v562_v5 }
  0x58   :  { %v311_v57 = vmin.f32 %v279_v1, 1.0  ;;  %v218_v10 = vadd.f32 0.5, %v186_v17  ;;  %1212 = vtanh.f32 %v1515_v45  ;;  %v528_v48 = vsel %vm336_vm10, %v1612_v59, %v496_v8 }
  0x59   :  { %2530 = vst [vmem:[#allocation41_spill] sm:$0xff] %v1676_v55  ;;  %v1682_v3 = vsub.f32 1.0, %v212_v28  ;;  %v1684_v16 = vsub.f32 1.0, %v213_v42  ;;  %v219_v0 = vadd.f32 0.5, %v187_v13  ;;  %v529_v63 = vsel %vm337_vm11, %v1623_v39, %v497_v19 }
  0x5a   :  { %v375_v41 = vmax.f32 %v215_v26, 1e-08  ;;  %v502_v44 = vsub.f32 1.0, %v310_v25  ;;  %v503_v5 = vsub.f32 1.0, %v311_v57  ;;  %vm2462_vm8 = vcmp.gt.f32.partialorder %v1484_v47, 0.5 }
  0x5b   :  { %2531 = vst [vmem:[#allocation42_spill] sm:$0xff] %v1682_v3  ;;  %2532 = vst [vmem:[#allocation43_spill] sm:$0xff] %v1684_v16  ;;  %v406_v45 = vsel %vm2449_vm12, %v374_v18, %v310_v25  ;;  %v276_v7 = vadd.f32 0.05, %v1682_v3  ;;  %v277_v8 = vadd.f32 0.05, %v1684_v16  ;;  %v1694_v54 = vpop.eup %1198  ;;  %v1696_v1 = vmul.f32 %v563_v12, %v563_v12 }
  0x5c   :  { %v372_v53 = vmax.f32 %v212_v28, 1e-08  ;;  %v560_v17 = vmul.f32 %v528_v48, %v528_v48  ;;  %v373_v13 = vmax.f32 %v213_v42, 1e-08  ;;  %v1698_v19 = vsub.f32 1.0, %v218_v10  ;;  %v1700_v26 = vpop.eup %1200  ;;  %v1709_v48 = vld [vmem:[#allocation5 + $0xa0] sm:$0xff] }
  0x5d   :  { %2533 = vst [vmem:[#allocation44_spill] sm:$0xff] %v1696_v1  ;;  %v561_v24 = vmul.f32 %v529_v63, %v529_v63  ;;  %v308_v11 = vmin.f32 %v276_v7, 1.0  ;;  %v309_v23 = vmin.f32 %v277_v8, 1.0  ;;  %v1702_v58 = vsub.f32 1.0, %v219_v0  ;;  %v1704_v18 = vpop.eup %1202  ;;  %2537 = vst [vmem:[#allocation48_spill] sm:$0xff] %v1709_v48  ;;  %v1711_v42 = vld [vmem:[#allocation5 + $0xa8] sm:$0xff] }
  0x5e   :  { %2534 = vst [vmem:[#allocation45_spill] sm:$0xff] %v1698_v19  ;;  %2536 = vst [vmem:[#allocation47_spill] sm:$0xff] %v1704_v18  ;;  %v407_v25 = vsel %vm2448_vm13, %v375_v41, %v311_v57  ;;  %1214 = vlog2.f32 %v406_v45  ;;  %v282_v12 = vadd.f32 0.05, %v1698_v19  ;;  %v378_v28 = vmax.f32 %v218_v10, 1e-08  ;;  %v1713_v1 = vpop.eup %1204 }
  0x5f   :  { %2535 = vst [vmem:[#allocation46_spill] sm:$0xff] %v1702_v58  ;;  %2538 = vst [vmem:[#allocation49_spill] sm:$0xff] %v1713_v1  ;;  %v534_v63 = vsel %vm2449_vm12, %v1660_v15, %v502_v44  ;;  %v535_v7 = vsel %vm2448_vm13, %v1662_v56, %v503_v5  ;;  %v404_v57 = vsel %vm340_vm14, %v372_v53, %v308_v11  ;;  %v500_v41 = vsub.f32 1.0, %v308_v11  ;;  %v60_v18 = vld [vmem:[#allocation2 + $0xa0] sm:$0xff] }
  0x60   :  { %v1723_v45 = vpop.eup %1206  ;;  %v405_v10 = vsel %vm341_vm15, %v373_v13, %v309_v23  ;;  %v501_v8 = vsub.f32 1.0, %v309_v23  ;;  %v283_v55 = vadd.f32 0.05, %v1702_v58  ;;  %v314_v1 = vmin.f32 %v282_v12, 1.0 }
  0x61   :  { %1216 = vlog2.f32 %v407_v25  ;;  %v532_v44 = vsel %vm340_vm14, %v1682_v3, %v500_v41  ;;  %v379_v5 = vmax.f32 %v219_v0, 1e-08  ;;  %v838_v53 = vadd.f32 %v1711_v42, %v1709_v48  ;;  %v1733_v11 = vpop.eup %1208 }
  0x62   :  { %v566_v33 = vmul.f32 %v534_v63, %v534_v63  ;;  %1218 = vlog2.f32 %v404_v57  ;;  %v315_v56 = vmin.f32 %v283_v55, 1.0  ;;  %v410_v23 = vsel %vm2463_vm9, %v378_v28, %v314_v1  ;;  %v1211_v32 = vpop.eup %1210  ;;  %v61_v55 = vld [vmem:[#allocation2 + $0xa8] sm:$0xff] }
  0x63   :  { %v1737_v13 = vmul.f32 %v560_v17, %v560_v17  ;;  %v567_v12 = vmul.f32 %v535_v7, %v535_v7  ;;  %1220 = vlog2.f32 %v405_v10  ;;  %839 = vadd.xlane.f32.xlu0 %v838_v53  ;;  %v124_v25 = vmul.f32 0.5, %v60_v18 }
  0x64   :  { %v533_v0 = vsel %vm341_vm15, %v1684_v16, %v501_v8  ;;  %v564_v41 = vmul.f32 %v532_v44, %v532_v44  ;;  %v506_v15 = vsub.f32 1.0, %v314_v1  ;;  %vm2464_vm13 = vcmp.gt.f32.partialorder %v1486_v50, 0.5  ;;  %v1754_v44 = vld [vmem:[#allocation5 + $0xd0] sm:$0xff] }
  0x65   :  { %1222 = vtanh.f32 %v1528_v9  ;;  %v1213_v63 = vpop.eup %1212  ;;  %v411_v17 = vsel %vm2462_vm8, %v379_v5, %v315_v56  ;;  %v507_v28 = vsub.f32 1.0, %v315_v56  ;;  %vm2465_vm12 = vcmp.gt.f32.partialorder %v1488_v51, 0.5  ;;  %2541 = vst [vmem:[#allocation52_spill] sm:$0xff] %v1754_v44  ;;  %v1756_v5 = vld [vmem:[#allocation5 + $0xd8] sm:$0xff]  ;;  %v66_v56 = vld [vmem:[#allocation2 + $0xd0] sm:$0xff] }
  0x66   :  { %1224 = vlog2.f32 %v410_v23  ;;  %v184_v18 = vmul.f32 0.5, %v1211_v32  ;;  %v1747_v7 = vmul.f32 %v561_v24, %v561_v24  ;;  %v1749_v57 = vmul.f32 %v566_v33, %v566_v33  ;;  %2542 = vst [vmem:[#allocation53_spill] sm:$0xff] %v1756_v5  ;;  %v67_v33 = vld [vmem:[#allocation2 + $0xd8] sm:$0xff] }
  0x67   :  { %v185_v10 = vmul.f32 0.5, %v1213_v63  ;;  %1226 = vtanh.f32 %v1542_v35  ;;  %v1752_v1 = vmul.f32 %v567_v12, %v567_v12  ;;  %v125_v8 = vmul.f32 0.5, %v61_v55  ;;  %v1770_v55 = vld [vmem:[#allocation5 + $0xc8] sm:$0xff] }
  0x68   :  { %2539 = vst [vmem:[#allocation50_spill] sm:$0xff] %v1749_v57  ;;  %v216_v9 = vadd.f32 0.5, %v184_v18  ;;  %1228 = vtanh.f32 %v124_v25  ;;  %v565_v53 = vmul.f32 %v533_v0, %v533_v0  ;;  %v538_v24 = vsel %vm2463_vm9, %v1698_v19, %v506_v15  ;;  %v1768_v25 = vld [vmem:[#allocation5 + $0xc0] sm:$0xff]  ;;  %v65_v18 = vld [vmem:[#allocation2 + $0xc8] sm:$0xff]  ;;  %v1781_v19 = vld [vmem:[#allocation5 + $0xf8] sm:$0xff] }
  0x69   :  { %2540 = vst [vmem:[#allocation51_spill] sm:$0xff] %v1752_v1  ;;  %1230 = vlog2.f32 %v411_v17  ;;  %v217_v32 = vadd.f32 0.5, %v185_v10  ;;  %v1761_v23 = vmul.f32 %v564_v41, %v564_v41  ;;  %v539_v35 = vsel %vm2462_vm8, %v1702_v58, %v507_v28  ;;  %v64_v0 = vld [vmem:[#allocation2 + $0xc0] sm:$0xff]  ;;  %v1776_v10 = vld [vmem:[#allocation5 + $0xf0] sm:$0xff]  ;;  %2547 = vst [vmem:[#allocation58_spill] sm:$0xff] %v1781_v19 }
  0x6a   :  { %v1766_v12 = vsub.f32 1.0, %v216_v9  ;;  %1232 = vtanh.f32 %v125_v8  ;;  %v376_v17 = vmax.f32 %v216_v9, 1e-08  ;;  %v847_v15 = vadd.f32 %v1756_v5, %v1754_v44  ;;  %2545 = vst [vmem:[#allocation56_spill] sm:$0xff] %v1776_v10  ;;  %v70_v57 = vld [vmem:[#allocation2 + $0xf0] sm:$0xff] }
  0x6b   :  { %v1772_v63 = vsub.f32 1.0, %v217_v32  ;;  %v130_v41 = vmul.f32 0.5, %v66_v56  ;;  %v1778_v47 = vpop.eup %1214  ;;  %v570_v28 = vmul.f32 %v538_v24, %v538_v24  ;;  %v377_v58 = vmax.f32 %v217_v32, 1e-08  ;;  %v71_v24 = vld [vmem:[#allocation2 + $0xf8] sm:$0xff] }
  0x6c   :  { %2543 = vst [vmem:[#allocation54_spill] sm:$0xff] %v1766_v12  ;;  %2546 = vst [vmem:[#allocation57_spill] sm:$0xff] %v1778_v47  ;;  %v280_v8 = vadd.f32 0.05, %v1766_v12  ;;  %v131_v46 = vmul.f32 0.5, %v67_v33  ;;  %848 = vadd.xlane.f32.xlu1 %v847_v15  ;;  %v844_v9 = vadd.f32 %v1770_v55, %v1768_v25  ;;  %v128_v56 = vmul.f32 0.5, %v64_v0 }
  0x6d   :  { %2544 = vst [vmem:[#allocation55_spill] sm:$0xff] %v1772_v63  ;;  %v281_v1 = vadd.f32 0.05, %v1772_v63  ;;  %1234 = vtanh.f32 %v130_v41  ;;  %v571_v38 = vmul.f32 %v539_v35, %v539_v35  ;;  %v129_v47 = vmul.f32 0.5, %v65_v18 }
  0x6e   :  { %v312_v16 = vmin.f32 %v280_v8, 1.0  ;;  %1236 = vtanh.f32 %v131_v46  ;;  %v1786_v37 = vpop.eup %1216  ;;  %v1788_v32 = vmul.f32 %v565_v53, %v565_v53  ;;  %845 = vadd.xlane.f32.xlu0 %v844_v9  ;;  %v853_v15 = vadd.f32 %v1781_v19, %v1776_v10  ;;  %v1800_v9 = vld [vmem:[#allocation5 + $0xe0] sm:$0xff] }
  0x6f   :  { %2548 = vst [vmem:[#allocation59_spill] sm:$0xff] %v1786_v37  ;;  %v313_v33 = vmin.f32 %v281_v1, 1.0  ;;  %1238 = vtanh.f32 %v128_v56  ;;  %v1792_v41 = vpop.eup %1218  ;;  %v134_v46 = vmul.f32 0.5, %v70_v57  ;;  %v135_v8 = vmul.f32 0.5, %v71_v24  ;;  %v1802_v56 = vld [vmem:[#allocation5 + $0xe8] sm:$0xff]  ;;  %v68_v37 = vld [vmem:[#allocation2 + $0xe0] sm:$0xff] }
  0x70   :  { %2549 = vst [vmem:[#allocation60_spill] sm:$0xff] %v1788_v32  ;;  %v408_v0 = vsel %vm2464_vm13, %v376_v17, %v312_v16  ;;  %v504_v35 = vsub.f32 1.0, %v312_v16  ;;  %1240 = vtanh.f32 %v129_v47  ;;  %v1796_v18 = vpop.eup %1220  ;;  %854 = vadd.xlane.f32.xlu1 %v853_v15  ;;  %v1804_v3 = vmul.f32 %v570_v28, %v570_v28 }
  0x71   :  { %v409_v53 = vsel %vm2465_vm12, %v377_v58, %v313_v33  ;;  %1242 = vlog2.f32 %v408_v0  ;;  %v505_v1 = vsub.f32 1.0, %v313_v33  ;;  %v1806_v16 = vmul.f32 %v571_v38, %v571_v38  ;;  %v69_v58 = vld [vmem:[#allocation2 + $0xe8] sm:$0xff] }
  0x72   :  { %v1223_v32 = vpop.eup %1222  ;;  %2550 = vst [vmem:[#allocation61_spill] sm:$0xff] %v1804_v3  ;;  %1244 = vlog2.f32 %v409_v53  ;;  %v536_v47 = vsel %vm2464_vm13, %v1766_v12, %v504_v35  ;;  %vm2481_vm8 = vcmp.gt.f32.partialorder %v1494_v61, 0.5  ;;  %vm2480_vm9 = vcmp.gt.f32.partialorder %v1496_v62, 0.5 }
  0x73   :  { %2551 = vst [vmem:[#allocation62_spill] sm:$0xff] %v1806_v16  ;;  %v1812_v57 = vpop.eup %1224  ;;  %v537_v17 = vsel %vm2465_vm12, %v1772_v63, %v505_v1  ;;  %v568_v24 = vmul.f32 %v536_v47, %v536_v47  ;;  %v190_v33 = vmul.f32 0.5, %v1223_v32  ;;  %1246 = vtanh.f32 %v134_v46 }
  0x74   :  { %2552 = vst [vmem:[#allocation63_spill] sm:$0xff] %v1812_v57  ;;  %v1227_v28 = vpop.eup %1226  ;;  %v569_v38 = vmul.f32 %v537_v17, %v537_v17  ;;  %1248 = vtanh.f32 %v135_v8  ;;  %v850_v15 = vadd.f32 %v1802_v56, %v1800_v9  ;;  %v132_v0 = vmul.f32 0.5, %v68_v37 }
  0x75   :  { %v1229_v35 = vpop.eup %1228  ;;  %v1820_v53 = vmul.f32 %v568_v24, %v568_v24  ;;  %v191_v16 = vmul.f32 0.5, %v1227_v28  ;;  %v222_v3 = vadd.f32 0.5, %v190_v33  ;;  %vm2485_vm13 = vcmp.gt.f32.partialorder %v1709_v48, 0.5 }
  0x76   :  { %v133_v1 = vmul.f32 0.5, %v69_v58  ;;  %v1823_v47 = vpop.eup %1230  ;;  %v1825_v32 = vmul.f32 %v569_v38, %v569_v38  ;;  %v188_v46 = vmul.f32 0.5, %v1229_v35  ;;  %851 = vadd.xlane.f32.xlu0 %v850_v15  ;;  %1250 = vtanh.f32 %v132_v0 }
  0x77   :  { %2553 = vst [vmem:[#allocation64_spill] sm:$0xff] %v1820_v53  ;;  %2554 = vst [vmem:[#allocation65_spill] sm:$0xff] %v1823_v47  ;;  %v429_v8 = vmul.f32 0.6931472, %v1694_v54  ;;  %v1233_v17 = vpop.eup %1232  ;;  %v223_v57 = vadd.f32 0.5, %v191_v16  ;;  %v1828_v37 = vsub.f32 1.0, %v222_v3  ;;  %v618_v38 = vsel %vm2470_vm6, %v1570_v29, %v1653_v22 }
  0x78   :  { %2555 = vst [vmem:[#allocation66_spill] sm:$0xff] %v1825_v32  ;;  %v382_v24 = vmax.f32 %v222_v3, 1e-08  ;;  %vm2484_vm12 = vcmp.gt.f32.partialorder %v1711_v42, 0.5  ;;  %1252 = vtanh.f32 %v133_v1  ;;  %v189_v33 = vmul.f32 0.5, %v1233_v17 }
  0x79   :  { %2556 = vst [vmem:[#allocation67_spill] sm:$0xff] %v1828_v37  ;;  %v220_v28 = vadd.f32 0.5, %v188_v46  ;;  %v431_v58 = vmul.f32 0.6931472, %v1700_v26  ;;  %v1836_v15 = vsub.f32 1.0, %v223_v57  ;;  %v619_v3 = vsel %vm2469_vm7, %v1572_v34, %v1657_v4 }
  0x7a   :  { %v286_v54 = vadd.f32 0.05, %v1828_v37  ;;  %v383_v16 = vmax.f32 %v223_v57, 1e-08  ;;  %v1235_v0 = vpop.eup %1234  ;;  %v221_v35 = vadd.f32 0.5, %v189_v33  ;;  %v1845_v46 = vmul.f32 %v618_v38, %v429_v8 }
  0x7b   :  { %2557 = vst [vmem:[#allocation68_spill] sm:$0xff] %v1836_v15  ;;  %v1843_v1 = vsub.f32 1.0, %v220_v28  ;;  %v380_v26 = vmax.f32 %v220_v28, 1e-08  ;;  %v1237_v17 = vpop.eup %1236  ;;  %v287_v29 = vadd.f32 0.05, %v1836_v15  ;;  %v1848_v51 = vmul.f32 %v619_v3, %v431_v58 }
  0x7c   :  { %v318_v22 = vmin.f32 %v286_v54, 1.0  ;;  %v194_v47 = vmul.f32 0.5, %v1235_v0  ;;  %v1239_v57 = vpop.eup %1238  ;;  %v1850_v63 = vsub.f32 1.0, %v221_v35  ;;  %v381_v34 = vmax.f32 %v221_v35, 1e-08 }
  0x7d   :  { %v284_v32 = vadd.f32 0.05, %v1843_v1  ;;  %vm2493_vm7 = vcmp.gt.f32.partialorder %v1754_v44, 0.5  ;;  %vm2491_vm6 = vcmp.gt.f32.partialorder %v1756_v5, 0.5  ;;  %v195_v4 = vmul.f32 0.5, %v1237_v17  ;;  %v1241_v8 = vpop.eup %1240 }
  0x7e   :  { %v319_v33 = vmin.f32 %v287_v29, 1.0  ;;  %v414_v28 = vsel %vm2481_vm8, %v382_v24, %v318_v22  ;;  %v510_v38 = vsub.f32 1.0, %v318_v22  ;;  %v226_v54 = vadd.f32 0.5, %v194_v47  ;;  %v1857_v58 = vpop.eup %1242 }
  0x7f   :  { %1254 = vlog2.f32 %v414_v28  ;;  %v285_v3 = vadd.f32 0.05, %v1850_v63  ;;  %v316_v0 = vmin.f32 %v284_v32, 1.0  ;;  %v227_v50 = vadd.f32 0.5, %v195_v4  ;;  %v1860_v35 = vpop.eup %1244 }
  0x80   :  { %v415_v12 = vsel %vm2480_vm9, %v383_v16, %v319_v33  ;;  %v511_v17 = vsub.f32 1.0, %v319_v33  ;;  %v542_v29 = vsel %vm2481_vm8, %v1828_v37, %v510_v38  ;;  %v1867_v24 = vsub.f32 1.0, %v226_v54  ;;  %v1247_v47 = vpop.eup %1246 }
  0x81   :  { %1256 = vlog2.f32 %v415_v12  ;;  %v574_v22 = vmul.f32 %v542_v29, %v542_v29  ;;  %v317_v28 = vmin.f32 %v285_v3, 1.0  ;;  %v412_v32 = vsel %vm2485_vm13, %v380_v26, %v316_v0  ;;  %v1249_v4 = vpop.eup %1248 }
  0x82   :  { %2558 = vst [vmem:[#allocation69_spill] sm:$0xff] %v1867_v24  ;;  %v543_v53 = vsel %vm2480_vm9, %v1836_v15, %v511_v17  ;;  %1258 = vlog2.f32 %v412_v32  ;;  %v508_v16 = vsub.f32 1.0, %v316_v0  ;;  %v1874_v33 = vsub.f32 1.0, %v227_v50 }
  0x83   :  { %v575_v61 = vmul.f32 %v543_v53, %v543_v53  ;;  %v1876_v38 = vmul.f32 %v574_v22, %v574_v22  ;;  %v413_v12 = vsel %vm2484_vm12, %v381_v34, %v317_v28  ;;  %v509_v29 = vsub.f32 1.0, %v317_v28  ;;  %v1251_v3 = vpop.eup %1250 }
  0x84   :  { %2559 = vst [vmem:[#allocation70_spill] sm:$0xff] %v1874_v33  ;;  %1260 = vlog2.f32 %v413_v12  ;;  %v540_v26 = vsel %vm2485_vm13, %v1843_v1, %v508_v16  ;;  %v290_v62 = vadd.f32 0.05, %v1867_v24  ;;  %v291_v17 = vadd.f32 0.05, %v1874_v33 }
  0x85   :  { %2560 = vst [vmem:[#allocation71_spill] sm:$0xff] %v1876_v38  ;;  %v1253_v0 = vpop.eup %1252  ;;  %v1885_v32 = vmul.f32 %v575_v61, %v575_v61  ;;  %v541_v53 = vsel %vm2484_vm12, %v1850_v63, %v509_v29  ;;  %v572_v22 = vmul.f32 %v540_v26, %v540_v26  ;;  %v386_v34 = vmax.f32 %v226_v54, 1e-08 }
  0x86   :  { %v573_v28 = vmul.f32 %v541_v53, %v541_v53  ;;  %v322_v15 = vmin.f32 %v290_v62, 1.0  ;;  %v323_v12 = vmin.f32 %v291_v17, 1.0  ;;  %v387_v37 = vmax.f32 %v227_v50, 1e-08 }
  0x87   :  { %2561 = vst [vmem:[#allocation72_spill] sm:$0xff] %v1885_v32  ;;  %vm352_vm9 = vcmp.gt.f32.partialorder %v1768_v25, 0.5  ;;  %vm353_vm8 = vcmp.gt.f32.partialorder %v1770_v55, 0.5  ;;  %v1892_v16 = vmul.f32 %v572_v22, %v572_v22  ;;  %v192_v38 = vmul.f32 0.5, %v1239_v57 }
  0x88   :  { %v193_v48 = vmul.f32 0.5, %v1241_v8  ;;  %v198_v61 = vmul.f32 0.5, %v1247_v47  ;;  %v1894_v32 = vmul.f32 %v573_v28, %v573_v28  ;;  %v418_v29 = vsel %vm2493_vm7, %v386_v34, %v322_v15 }
  0x89   :  { %v419_v54 = vsel %vm2491_vm6, %v387_v37, %v323_v12  ;;  %v514_v62 = vsub.f32 1.0, %v322_v15  ;;  %1262 = vlog2.f32 %v418_v29  ;;  %v515_v50 = vsub.f32 1.0, %v323_v12 }
  0x8a   :  { %v224_v26 = vadd.f32 0.5, %v192_v38  ;;  %v225_v17 = vadd.f32 0.5, %v193_v48  ;;  %vm358_vm12 = vcmp.gt.f32.partialorder %v1776_v10, 0.5  ;;  %vm359_vm13 = vcmp.gt.f32.partialorder %v1781_v19, 0.5  ;;  %v2570_v10 = vld [vmem:[#allocation30_spill] sm:$0xff]  ;;  %v2583_v19 = vld [vmem:[#allocation32_spill] sm:$0xff] }
  0x8b   :  { %1264 = vlog2.f32 %v419_v54  ;;  %v546_v57 = vsel %vm2493_vm7, %v1867_v24, %v514_v62  ;;  %v199_v8 = vmul.f32 0.5, %v1249_v4  ;;  %v230_v47 = vadd.f32 0.5, %v198_v61 }
  0x8c   :  { %v547_v37 = vsel %vm2491_vm6, %v1874_v33, %v515_v50  ;;  %v578_v15 = vmul.f32 %v546_v57, %v546_v57  ;;  %v1908_v53 = vsub.f32 1.0, %v224_v26  ;;  %v1910_v38 = vsub.f32 1.0, %v225_v17  ;;  %v1912_v48 = vpop.eup %1254 }
  0x8d   :  { %2562 = vst [vmem:[#allocation73_spill] sm:$0xff] %v1912_v48  ;;  %v579_v22 = vmul.f32 %v547_v37, %v547_v37  ;;  %v384_v34 = vmax.f32 %v224_v26, 1e-08  ;;  %v385_v28 = vmax.f32 %v225_v17, 1e-08  ;;  %v231_v12 = vadd.f32 0.5, %v199_v8 }
  0x8e   :  { %v1914_v29 = vmul.f32 %v578_v15, %v578_v15  ;;  %v288_v4 = vadd.f32 0.05, %v1908_v53  ;;  %v289_v61 = vadd.f32 0.05, %v1910_v38  ;;  %v1918_v54 = vsub.f32 1.0, %v230_v47  ;;  %v1920_v62 = vpop.eup %1256 }
  0x8f   :  { %2565 = vst [vmem:[#allocation76_spill] sm:$0xff] %v1920_v62  ;;  %v1922_v50 = vmul.f32 %v579_v22, %v579_v22  ;;  %v1924_v57 = vsub.f32 1.0, %v231_v12  ;;  %v390_v5 = vmax.f32 %v230_v47, 1e-08  ;;  %v391_v33 = vmax.f32 %v231_v12, 1e-08  ;;  %v1926_v37 = vpop.eup %1258 }
  0x90   :  { %2563 = vst [vmem:[#allocation74_spill] sm:$0xff] %v1914_v29  ;;  %2564 = vst [vmem:[#allocation75_spill] sm:$0xff] %v1918_v54  ;;  %v320_v26 = vmin.f32 %v288_v4, 1.0  ;;  %v321_v17 = vmin.f32 %v289_v61, 1.0  ;;  %v294_v8 = vadd.f32 0.05, %v1918_v54  ;;  %v763_v22 = vadd.f32 %v1848_v51, %v1845_v46 }
  0x91   :  { %2566 = vst [vmem:[#allocation77_spill] sm:$0xff] %v1922_v50  ;;  %2567 = vst [vmem:[#allocation78_spill] sm:$0xff] %v1924_v57  ;;  %v196_v15 = vmul.f32 0.5, %v1251_v3  ;;  %v295_v44 = vadd.f32 0.05, %v1924_v57  ;;  %vm356_vm6 = vcmp.gt.f32.partialorder %v1800_v9, 0.5  ;;  %v1934_v29 = vpop.eup %1260 }
  0x92   :  { %v197_v24 = vmul.f32 0.5, %v1253_v0  ;;  %v425_v50 = vmul.f32 0.6931472, %v1619_v36  ;;  %v416_v47 = vsel %vm352_vm9, %v384_v34, %v320_v26  ;;  %v417_v12 = vsel %vm353_vm8, %v385_v28, %v321_v17  ;;  %764 = vadd.xlane.f32.xlu1 %v763_v22 }
  0x93   :  { %v512_v4 = vsub.f32 1.0, %v320_v26  ;;  %v513_v3 = vsub.f32 1.0, %v321_v17  ;;  %vm357_vm7 = vcmp.gt.f32.partialorder %v1802_v56, 0.5  ;;  %1266 = vlog2.f32 %v416_v47 }
  0x94   :  { %v326_v61 = vmin.f32 %v294_v8, 1.0  ;;  %v327_v0 = vmin.f32 %v295_v44, 1.0  ;;  %v228_v62 = vadd.f32 0.5, %v196_v15  ;;  %1268 = vlog2.f32 %v417_v12 }
  0x95   :  { %v544_v36 = vsel %vm352_vm9, %v1908_v53, %v512_v4  ;;  %v545_v34 = vsel %vm353_vm8, %v1910_v38, %v513_v3  ;;  %v229_v48 = vadd.f32 0.5, %v197_v24 }
  0x96   :  { %v576_v28 = vmul.f32 %v544_v36, %v544_v36  ;;  %v577_v26 = vmul.f32 %v545_v34, %v545_v34  ;;  %v422_v17 = vsel %vm358_vm12, %v390_v5, %v326_v61  ;;  %v423_v44 = vsel %vm359_vm13, %v391_v33, %v327_v0  ;;  %v1953_v47 = vpop.eup %1262 }
  0x97   :  { %1270 = vlog2.f32 %v422_v17  ;;  %v518_v8 = vsub.f32 1.0, %v326_v61  ;;  %v519_v15 = vsub.f32 1.0, %v327_v0  ;;  %v1951_v22 = vsub.f32 1.0, %v228_v62  ;;  %2568 = vst [vmem:[#allocation79_spill] sm:$0xff] %v1953_v47  ;;  %v2574_v47 = vld [vmem:[#allocation38_spill] sm:$0xff] }
  0x98   :  { %v1955_v12 = vmul.f32 %v576_v28, %v576_v28  ;;  %v1957_v4 = vmul.f32 %v577_v26, %v577_v26  ;;  %1272 = vlog2.f32 %v423_v44  ;;  %v1959_v24 = vsub.f32 1.0, %v229_v48  ;;  %v1961_v3 = vpop.eup %1264 }
  0x99   :  { %2569 = vst [vmem:[#allocation80_spill] sm:$0xff] %v1961_v3  ;;  %v550_v5 = vsel %vm358_vm12, %v1918_v54, %v518_v8  ;;  %v551_v33 = vsel %vm359_vm13, %v1924_v57, %v519_v15  ;;  %v292_v61 = vadd.f32 0.05, %v1951_v22  ;;  %v388_v0 = vmax.f32 %v228_v62, 1e-08  ;;  %v2573_v54 = vld [vmem:[#allocation37_spill] sm:$0xff] }
  0x9a   :  { %v582_v36 = vmul.f32 %v550_v5, %v550_v5  ;;  %v583_v34 = vmul.f32 %v551_v33, %v551_v33  ;;  %v293_v28 = vadd.f32 0.05, %v1959_v24  ;;  %v389_v26 = vmax.f32 %v229_v48, 1e-08 }
  0x9b   :  { %v324_v17 = vmin.f32 %v292_v61, 1.0  ;;  %v427_v44 = vmul.f32 0.6931472, %v1629_v40  ;;  %v616_v8 = vsel %vm328_vm2, %v1511_v43, %v1578_v52  ;;  %v617_v15 = vsel %vm329_vm3, %v2570_v10, %v1601_v2 }
  0x9c   :  { %v1980_v57 = vmul.f32 %v582_v36, %v582_v36  ;;  %v1982_v62 = vmul.f32 %v583_v34, %v583_v34  ;;  %v325_v5 = vmin.f32 %v293_v28, 1.0  ;;  %v648_v33 = vmul.f32 %v616_v8, %v425_v50  ;;  %v2575_v36 = vld [vmem:[#allocation33_spill] sm:$0xff]  ;;  %v2576_v34 = vld [vmem:[#allocation28_spill] sm:$0xff] }
  0x9d   :  { %v420_v48 = vsel %vm356_vm6, %v388_v0, %v324_v17  ;;  %v516_v40 = vsub.f32 1.0, %v324_v17  ;;  %v649_v61 = vmul.f32 %v617_v15, %v427_v44  ;;  %v433_v3 = vmul.f32 0.6931472, %v2573_v54  ;;  %v2578_v17 = vld [vmem:[#allocation34_spill] sm:$0xff]  ;;  %v2579_v44 = vld [vmem:[#allocation29_spill] sm:$0xff] }
  0x9e   :  { %2572 = vst [vmem:[#allocation30_spill] sm:$0xff] %v1982_v62  ;;  %v421_v43 = vsel %vm357_vm7, %v389_v26, %v325_v5  ;;  %1274 = vlog2.f32 %v420_v48  ;;  %v517_v52 = vsub.f32 1.0, %v325_v5  ;;  %v435_v2 = vmul.f32 0.6931472, %v2574_v47 }
  0x9f   :  { %1276 = vlog2.f32 %v421_v43  ;;  %v548_v10 = vsel %vm356_vm6, %v1951_v22, %v516_v40  ;;  %v760_v50 = vadd.f32 %v649_v61, %v648_v33  ;;  %v620_v28 = vsel %vm332_vm0, %v2576_v34, %v2575_v36 }
  0xa0   :  { %v549_v54 = vsel %vm357_vm7, %v1959_v24, %v517_v52  ;;  %v580_v26 = vmul.f32 %v548_v10, %v548_v10  ;;  %v621_v47 = vsel %vm333_vm1, %v2579_v44, %v2578_v17  ;;  %v652_v15 = vmul.f32 %v620_v28, %v433_v3  ;;  %v2004_v5 = vpop.eup %1266 }
  0xa1   :  { %v581_v48 = vmul.f32 %v549_v54, %v549_v54  ;;  %761 = vadd.xlane.f32.xlu0 %v760_v50  ;;  %v653_v40 = vmul.f32 %v621_v47, %v435_v2  ;;  %v680_v43 = vsel %vm328_vm2, %v648_v33, 0.0  ;;  %v681_v36 = vsel %vm329_vm3, %v649_v61, 0.0  ;;  %v2010_v34 = vpop.eup %1268  ;;  %v2581_v2 = vld [vmem:[#allocation31_spill] sm:$0xff] }
  0xa2   :  { %v2012_v52 = vmul.f32 %v580_v26, %v580_v26  ;;  %v712_v10 = vadd.f32 %v681_v36, %v680_v43  ;;  %v437_v62 = vmul.f32 0.6931472, %v1638_v60  ;;  %v439_v3 = vmul.f32 0.6931472, %v1665_v31  ;;  %v2585_v36 = vld [vmem:[#allocation47_spill] sm:$0xff] }
  0xa3   :  { %v2016_v28 = vmul.f32 %v581_v48, %v581_v48  ;;  %v766_v54 = vadd.f32 %v653_v40, %v652_v15  ;;  %v622_v6 = vsel %vm334_vm4, %v2581_v2, %v1640_v49  ;;  %v623_v61 = vsel %vm335_vm5, %v2583_v19, %v1648_v14  ;;  %v2589_v2 = vld [vmem:[#allocation16_spill] sm:$0xff] }
  0xa4   :  { %v2026_v26 = vpop.eup %1270  ;;  %v654_v17 = vmul.f32 %v622_v6, %v437_v62  ;;  %v655_v44 = vmul.f32 %v623_v61, %v439_v3  ;;  %v684_v60 = vsel %vm332_vm0, %v652_v15, 0.0  ;;  %v685_v31 = vsel %vm333_vm1, %v653_v40, 0.0  ;;  %v2586_v3 = vld [vmem:[#allocation49_spill] sm:$0xff]  ;;  %v2591_v19 = vld [vmem:[#allocation44_spill] sm:$0xff] }
  0xa5   :  { %v2032_v47 = vpop.eup %1272  ;;  %767 = vadd.xlane.f32.xlu1 %v766_v54  ;;  %713 = vadd.xlane.f32.xlu0 %v712_v10  ;;  %v718_v49 = vadd.f32 %v685_v31, %v684_v60  ;;  %v441_v48 = vmul.f32 0.6931472, %v1723_v45  ;;  %v443_v43 = vmul.f32 0.6931472, %v1733_v11  ;;  %v624_v14 = vsel %vm336_vm10, %v1612_v59, %v1737_v13  ;;  %v2587_v59 = vld [vmem:[#allocation41_spill] sm:$0xff]  ;;  %v2588_v13 = vld [vmem:[#allocation35_spill] sm:$0xff] }
  0xa6   :  { %v769_v62 = vadd.f32 %v655_v44, %v654_v17  ;;  %v625_v0 = vsel %vm337_vm11, %v1623_v39, %v1747_v7  ;;  %v686_v8 = vsel %vm334_vm4, %v654_v17, 0.0  ;;  %v687_v15 = vsel %vm335_vm5, %v655_v44, 0.0  ;;  %v2592_v39 = vld [vmem:[#allocation36_spill] sm:$0xff]  ;;  %v2593_v7 = vld [vmem:[#allocation17_spill] sm:$0xff] }
  0xa7   :  { %v656_v45 = vmul.f32 %v624_v14, %v441_v48  ;;  %v657_v40 = vmul.f32 %v625_v0, %v443_v43  ;;  %v721_v11 = vadd.f32 %v687_v15, %v686_v8  ;;  %v445_v10 = vmul.f32 0.6931472, %v2585_v36  ;;  %v2595_v14 = vld [vmem:[#allocation42_spill] sm:$0xff]  ;;  %v2614_v0 = vld [vmem:[#allocation64_spill] sm:$0xff] }
  0xa8   :  { %v447_v54 = vmul.f32 0.6931472, %v2586_v3  ;;  %vm2590_vm0 = vcmp.gt.f32.partialorder %v2589_v2, 0.5  ;;  %vm2594_vm1 = vcmp.gt.f32.partialorder %v2593_v7, 0.5  ;;  %v449_v33 = vmul.f32 0.6931472, %v1792_v41  ;;  %v816_v56 = vpop.xlane.xlu1 %815 }
  0xa9   :  { %v626_v6 = vsel %vm2590_vm0, %v2588_v13, %v2587_v59  ;;  %v627_v50 = vsel %vm2594_vm1, %v2592_v39, %v2591_v19  ;;  %770 = vadd.xlane.f32.xlu1 %v769_v62  ;;  %719 = vadd.xlane.f32.xlu0 %v718_v49  ;;  %v772_v61 = vadd.f32 %v657_v40, %v656_v45  ;;  %v688_v44 = vsel %vm336_vm10, %v656_v45, 0.0  ;;  %v2597_v49 = vld [vmem:[#allocation60_spill] sm:$0xff]  ;;  %v2598_v62 = vld [vmem:[#allocation43_spill] sm:$0xff]  ;;  %vm2600_vm2 = vmmov %vm2590_vm0 }
  0xaa   :  { %v658_v17 = vmul.f32 %v626_v6, %v445_v10  ;;  %v689_v60 = vsel %vm337_vm11, %v657_v40, 0.0  ;;  %v659_v31 = vmul.f32 %v627_v50, %v447_v54  ;;  %v451_v43 = vmul.f32 0.6931472, %v1796_v18  ;;  %vm2602_vm4 = vmmov %vm2594_vm1  ;;  %v2605_v19 = vld [vmem:[#allocation59_spill] sm:$0xff]  ;;  %v2606_v7 = vld [vmem:[#allocation50_spill] sm:$0xff] }
  0xab   :  { %v724_v48 = vadd.f32 %v689_v60, %v688_v44  ;;  %v628_v8 = vsel %vm340_vm14, %v2595_v14, %v1761_v23  ;;  %v2068_v41 = vpop.eup %1274  ;;  %v629_v27 = vsel %vm341_vm15, %v2598_v62, %v2597_v49  ;;  %vm2601_vm3 = vcmp.gt.f32.partialorder %v1452_v20, 0.5  ;;  %v2604_v20 = vld [vmem:[#allocation57_spill] sm:$0xff]  ;;  %v2607_v50 = vld [vmem:[#allocation39_spill] sm:$0xff]  ;;  %v2616_v49 = vld [vmem:[#allocation24_spill] sm:$0xff] }
  0xac   :  { %v660_v45 = vmul.f32 %v628_v8, %v449_v33  ;;  %v690_v30 = vsel %vm2600_vm2, %v658_v17, 0.0  ;;  %v682_v18 = vsel %vm2601_vm3, %v1845_v46, 0.0  ;;  %v2079_v40 = vpop.eup %1276  ;;  %v775_v36 = vadd.f32 %v659_v31, %v658_v17  ;;  %v2608_v33 = vld [vmem:[#allocation18_spill] sm:$0xff]  ;;  %v2612_v17 = vld [vmem:[#allocation19_spill] sm:$0xff] }
  0xad   :  { %v661_v10 = vmul.f32 %v629_v27, %v451_v43  ;;  %v691_v23 = vsel %vm2602_vm4, %v659_v31, 0.0  ;;  %vm2603_vm5 = vcmp.gt.f32.partialorder %v1454_v21, 0.5  ;;  %773 = vadd.xlane.f32.xlu1 %v772_v61  ;;  %722 = vadd.xlane.f32.xlu0 %v721_v11  ;;  %v453_v46 = vmul.f32 0.6931472, %v2604_v20  ;;  %v2610_v11 = vld [vmem:[#allocation51_spill] sm:$0xff]  ;;  %v2611_v61 = vld [vmem:[#allocation40_spill] sm:$0xff] }
  0xae   :  { %v683_v3 = vsel %vm2603_vm5, %v1848_v51, 0.0  ;;  %v727_v54 = vadd.f32 %v691_v23, %v690_v30  ;;  %v692_v13 = vsel %vm340_vm14, %v660_v45, 0.0  ;;  %v455_v39 = vmul.f32 0.6931472, %v2605_v19  ;;  %v2615_v8 = vld [vmem:[#allocation54_spill] sm:$0xff]  ;;  %v2619_v27 = vld [vmem:[#allocation55_spill] sm:$0xff] }
  0xaf   :  { %v715_v59 = vadd.f32 %v683_v3, %v682_v18  ;;  %v778_v2 = vadd.f32 %v661_v10, %v660_v45  ;;  %v693_v6 = vsel %vm341_vm15, %v661_v10, 0.0  ;;  %vm2609_vm10 = vcmp.gt.f32.partialorder %v2608_v33, 0.5  ;;  %v2618_v15 = vld [vmem:[#allocation66_spill] sm:$0xff]  ;;  %v2620_v45 = vld [vmem:[#allocation25_spill] sm:$0xff] }
  0xb0   :  { %v630_v21 = vsel %vm2609_vm10, %v2607_v50, %v2606_v7  ;;  %v730_v51 = vadd.f32 %v693_v6, %v692_v13  ;;  %vm2613_vm11 = vcmp.gt.f32.partialorder %v2612_v17, 0.5  ;;  %v457_v31 = vmul.f32 0.6931472, %v1857_v58  ;;  %vm2622_vm0 = vmmov %vm2609_vm10  ;;  %v2623_v58 = vld [vmem:[#allocation63_spill] sm:$0xff]  ;;  %v2624_v3 = vld [vmem:[#allocation65_spill] sm:$0xff] }
  0xb1   :  { %v631_v44 = vsel %vm2613_vm11, %v2611_v61, %v2610_v11  ;;  %v662_v60 = vmul.f32 %v630_v21, %v453_v46  ;;  %v459_v14 = vmul.f32 0.6931472, %v1860_v35  ;;  %vm2617_vm14 = vcmp.gt.f32.partialorder %v2616_v49, 0.5  ;;  %776 = vadd.xlane.f32.xlu1 %v775_v36  ;;  %725 = vadd.xlane.f32.xlu0 %v724_v48  ;;  %vm2625_vm1 = vmmov %vm2613_vm11  ;;  %v2626_v6 = vld [vmem:[#allocation61_spill] sm:$0xff]  ;;  %v2631_v50 = vld [vmem:[#allocation62_spill] sm:$0xff] }
  0xb2   :  { %v663_v43 = vmul.f32 %v631_v44, %v455_v39  ;;  %v632_v62 = vsel %vm2617_vm14, %v2615_v8, %v2614_v0  ;;  %vm2621_vm15 = vcmp.gt.f32.partialorder %v2620_v45, 0.5  ;;  %v461_v23 = vmul.f32 0.6931472, %v2623_v58  ;;  %v2627_v19 = vld [vmem:[#allocation45_spill] sm:$0xff]  ;;  %v2628_v39 = vld [vmem:[#allocation22_spill] sm:$0xff]  ;;  %vm2630_vm3 = vmmov %vm2617_vm14 }
  0xb3   :  { %v633_v30 = vsel %vm2621_vm15, %v2619_v27, %v2618_v15  ;;  %v694_v18 = vsel %vm2622_vm0, %v662_v60, 0.0  ;;  %v664_v10 = vmul.f32 %v632_v62, %v457_v31  ;;  %v463_v35 = vmul.f32 0.6931472, %v2624_v3  ;;  %v2632_v33 = vld [vmem:[#allocation46_spill] sm:$0xff]  ;;  %v2633_v21 = vld [vmem:[#allocation23_spill] sm:$0xff]  ;;  %vm2635_vm5 = vmmov %vm2621_vm15 }
  0xb4   :  { %v781_v13 = vadd.f32 %v663_v43, %v662_v60  ;;  %v695_v20 = vsel %vm2625_vm1, %v663_v43, 0.0  ;;  %v665_v46 = vmul.f32 %v633_v30, %v459_v14  ;;  %vm2629_vm2 = vcmp.gt.f32.partialorder %v2628_v39, 0.5  ;;  %v2637_v8 = vld [vmem:[#allocation48_spill] sm:$0xff]  ;;  %v2641_v45 = vld [vmem:[#allocation73_spill] sm:$0xff]  ;;  %v2646_v58 = vld [vmem:[#allocation26_spill] sm:$0xff] }
  0xb5   :  { %v634_v7 = vsel %vm2629_vm2, %v2627_v19, %v2626_v6  ;;  %v733_v36 = vadd.f32 %v695_v20, %v694_v18  ;;  %v696_v48 = vsel %vm2630_vm3, %v664_v10, 0.0  ;;  %vm2634_vm4 = vcmp.gt.f32.partialorder %v2633_v21, 0.5  ;;  %779 = vadd.xlane.f32.xlu1 %v778_v2  ;;  %728 = vadd.xlane.f32.xlu0 %v727_v54  ;;  %vm2636_vm10 = vmmov %vm2629_vm2  ;;  %v2648_v3 = vld [vmem:[#allocation72_spill] sm:$0xff]  ;;  %v2650_v20 = vld [vmem:[#allocation27_spill] sm:$0xff] }
  0xb6   :  { %v635_v11 = vsel %vm2634_vm4, %v2632_v33, %v2631_v50  ;;  %v666_v61 = vmul.f32 %v634_v7, %v461_v23  ;;  %v784_v44 = vadd.f32 %v665_v46, %v664_v10  ;;  %v697_v17 = vsel %vm2635_vm5, %v665_v46, 0.0  ;;  %vm2639_vm14 = vmmov %vm2634_vm4 }
  0xb7   :  { %v667_v60 = vmul.f32 %v635_v11, %v463_v35  ;;  %v465_v31 = vmul.f32 0.6931472, %v1926_v37  ;;  %v736_v43 = vadd.f32 %v697_v17, %v696_v48  ;;  %v467_v0 = vmul.f32 0.6931472, %v1934_v29  ;;  %v2642_v29 = vld [vmem:[#allocation76_spill] sm:$0xff]  ;;  %v2655_v11 = vld [vmem:[#allocation79_spill] sm:$0xff] }
  0xb8   :  { %v698_v14 = vsel %vm2636_vm10, %v666_v61, 0.0  ;;  %vm2638_vm11 = vcmp.gt.f32.partialorder %v2637_v8, 0.5  ;;  %vm2640_vm15 = vcmp.gt.f32.partialorder %v1711_v42, 0.5  ;;  %v469_v30 = vmul.f32 0.6931472, %v2641_v45  ;;  %v2649_v35 = vld [vmem:[#allocation68_spill] sm:$0xff] }
  0xb9   :  { %v636_v49 = vsel %vm2638_vm11, %v1843_v1, %v1892_v16  ;;  %v787_v62 = vadd.f32 %v667_v60, %v666_v61  ;;  %v699_v15 = vsel %vm2639_vm14, %v667_v60, 0.0  ;;  %v637_v37 = vsel %vm2640_vm15, %v1850_v63, %v1894_v32  ;;  %vm2643_vm0 = vmmov %vm2638_vm11  ;;  %v2644_v1 = vld [vmem:[#allocation71_spill] sm:$0xff]  ;;  %716 = vadd.xlane.f32.xlu1 %v715_v59  ;;  %731 = vadd.xlane.f32.xlu0 %v730_v51  ;;  %v2656_v17 = vld [vmem:[#allocation80_spill] sm:$0xff] }
  0xba   :  { %v668_v54 = vmul.f32 %v636_v49, %v465_v31  ;;  %v739_v2 = vadd.f32 %v699_v15, %v698_v14  ;;  %v669_v27 = vmul.f32 %v637_v37, %v467_v0  ;;  %v471_v18 = vmul.f32 0.6931472, %v2642_v29  ;;  %v2645_v16 = vld [vmem:[#allocation67_spill] sm:$0xff]  ;;  %vm2652_vm3 = vmmov %vm2640_vm15  ;;  %v2661_v14 = vld [vmem:[#allocation77_spill] sm:$0xff] }
  0xbb   :  { %vm2647_vm1 = vcmp.gt.f32.partialorder %v2646_v58, 0.5  ;;  %vm2651_vm2 = vcmp.gt.f32.partialorder %v2650_v20, 0.5  ;;  %v473_v32 = vmul.f32 0.6931472, %v2004_v5  ;;  %v475_v48 = vmul.f32 0.6931472, %v2010_v34 }
  0xbc   :  { %v700_v10 = vsel %vm2643_vm0, %v668_v54, 0.0  ;;  %v638_v23 = vsel %vm2647_vm1, %v2645_v16, %v2644_v1  ;;  %v639_v63 = vsel %vm2651_vm2, %v2649_v35, %v2648_v3  ;;  %v790_v46 = vadd.f32 %v669_v27, %v668_v54  ;;  %vm2653_vm4 = vmmov %vm2647_vm1  ;;  %v2662_v0 = vld [vmem:[#allocation70_spill] sm:$0xff]  ;;  %v2663_v8 = vld [vmem:[#allocation53_spill] sm:$0xff] }
  0xbd   :  { %v701_v6 = vsel %vm2652_vm3, %v669_v27, 0.0  ;;  %v670_v19 = vmul.f32 %v638_v23, %v469_v30  ;;  %v671_v39 = vmul.f32 %v639_v63, %v471_v18  ;;  %v640_v50 = vsel %vm352_vm9, %v1908_v53, %v1955_v12  ;;  %vm2654_vm5 = vmmov %vm2651_vm2  ;;  %782 = vadd.xlane.f32.xlu1 %v781_v13  ;;  %734 = vadd.xlane.f32.xlu0 %v733_v36  ;;  %v2658_v12 = vld [vmem:[#allocation69_spill] sm:$0xff]  ;;  %v2669_v58 = vld [vmem:[#allocation30_spill] sm:$0xff] }
  0xbe   :  { %v742_v7 = vadd.f32 %v701_v6, %v700_v10  ;;  %v641_v5 = vsel %vm353_vm8, %v1910_v38, %v1957_v4  ;;  %v672_v33 = vmul.f32 %v640_v50, %v473_v32  ;;  %v477_v61 = vmul.f32 0.6931472, %v2655_v11  ;;  %v2657_v38 = vld [vmem:[#allocation74_spill] sm:$0xff]  ;;  %v2659_v4 = vld [vmem:[#allocation52_spill] sm:$0xff] }
  0xbf   :  { %v793_v59 = vadd.f32 %v671_v39, %v670_v19  ;;  %v702_v42 = vsel %vm2653_vm4, %v670_v19, 0.0  ;;  %v703_v51 = vsel %vm2654_vm5, %v671_v39, 0.0  ;;  %v673_v34 = vmul.f32 %v641_v5, %v475_v48  ;;  %v2670_v23 = vld [vmem:[#allocation78_spill] sm:$0xff] }
  0xc0   :  { %v745_v21 = vadd.f32 %v703_v51, %v702_v42  ;;  %v479_v60 = vmul.f32 0.6931472, %v2656_v17  ;;  %v704_v53 = vsel %vm352_vm9, %v672_v33, 0.0  ;;  %vm2660_vm10 = vcmp.gt.f32.partialorder %v2659_v4, 0.5 }
  0xc1   :  { %v642_v31 = vsel %vm2660_vm10, %v2658_v12, %v2657_v38  ;;  %vm2664_vm11 = vcmp.gt.f32.partialorder %v2663_v8, 0.5  ;;  %v481_v15 = vmul.f32 0.6931472, %v2068_v41  ;;  %v796_v37 = vadd.f32 %v673_v34, %v672_v33  ;;  %vm2665_vm9 = vmmov %vm2660_vm10  ;;  %785 = vadd.xlane.f32.xlu1 %v784_v44  ;;  %737 = vadd.xlane.f32.xlu0 %v736_v43 }
  0xc2   :  { %v643_v49 = vsel %vm2664_vm11, %v2662_v0, %v2661_v14  ;;  %v705_v13 = vsel %vm353_vm8, %v673_v34, 0.0  ;;  %v674_v36 = vmul.f32 %v642_v31, %v477_v61  ;;  %v483_v27 = vmul.f32 0.6931472, %v2079_v40  ;;  %vm2666_vm8 = vmmov %vm2664_vm11 }
  0xc3   :  { %v675_v54 = vmul.f32 %v643_v49, %v479_v60  ;;  %v748_v25 = vadd.f32 %v705_v13, %v704_v53  ;;  %v644_v45 = vsel %vm356_vm6, %v1951_v22, %v2012_v52  ;;  %v645_v30 = vsel %vm357_vm7, %v1959_v24, %v2016_v28  ;;  %v2667_v24 = vld [vmem:[#allocation75_spill] sm:$0xff] }
  0xc4   :  { %v706_v55 = vsel %vm2665_vm9, %v674_v36, 0.0  ;;  %v676_v18 = vmul.f32 %v644_v45, %v481_v15  ;;  %v677_v10 = vmul.f32 %v645_v30, %v483_v27  ;;  %v485_v1 = vmul.f32 0.6931472, %v2026_v26 }
  0xc5   :  { %v799_v41 = vadd.f32 %v675_v54, %v674_v36  ;;  %v707_v29 = vsel %vm2666_vm8, %v675_v54, 0.0  ;;  %v487_v22 = vmul.f32 0.6931472, %v2032_v47  ;;  %v646_v16 = vsel %vm358_vm12, %v2667_v24, %v1980_v57  ;;  %788 = vadd.xlane.f32.xlu1 %v787_v62  ;;  %740 = vadd.xlane.f32.xlu0 %v739_v2  ;;  %v810_v62 = vpop.xlane.xlu0 %809  ;;  %v819_v2 = vpop.xlane.xlu1 %818 }
  0xc6   :  { %v751_v40 = vadd.f32 %v707_v29, %v706_v55  ;;  %v708_v52 = vsel %vm356_vm6, %v676_v18, 0.0  ;;  %v647_v44 = vsel %vm359_vm13, %v2670_v23, %v2669_v58  ;;  %v802_v43 = vadd.f32 %v677_v10, %v676_v18 }
  0xc7   :  { %v709_v35 = vsel %vm357_vm7, %v677_v10, 0.0  ;;  %v678_v26 = vmul.f32 %v646_v16, %v485_v1  ;;  %v679_v20 = vmul.f32 %v647_v44, %v487_v22  ;;  %v872_v61 = vsub.f32 256.0, %v810_v62 }
  0xc8   :  { %v754_v47 = vadd.f32 %v709_v35, %v708_v52  ;;  %v874_v17 = vsub.f32 256.0, %v816_v56  ;;  %v890_v60 = vadd.f32 1e-08, %v816_v56  ;;  %v888_v14 = vadd.f32 1e-08, %v810_v62 }
  0xc9   :  { %v805_v9 = vadd.f32 %v679_v20, %v678_v26  ;;  %v710_v63 = vsel %vm358_vm12, %v678_v26, 0.0  ;;  %v711_v57 = vsel %vm359_vm13, %v679_v20, 0.0  ;;  %791 = vadd.xlane.f32.xlu1 %v790_v46  ;;  %743 = vadd.xlane.f32.xlu0 %v742_v7  ;;  %v813_v6 = vpop.xlane.xlu0 %812  ;;  %v825_v19 = vpop.xlane.xlu1 %824  ;;  %v936_v12 = vadd.f32 1e-08, %v872_v61 }
  0xca   :  { %v757_v32 = vadd.f32 %v711_v57, %v710_v63  ;;  %v873_v4 = vsub.f32 256.0, %v813_v6  ;;  %v938_v31 = vadd.f32 1e-08, %v874_v17  ;;  %1278 = vrcp.f32 %v890_v60 }
  0xcb   :  { %v889_v0 = vadd.f32 1e-08, %v813_v6  ;;  %1280 = vrcp.f32 %v936_v12  ;;  %v875_v36 = vsub.f32 256.0, %v819_v2  ;;  %v891_v54 = vadd.f32 1e-08, %v819_v2 }
  0xcc   :  { %v937_v15 = vadd.f32 1e-08, %v873_v4  ;;  %1282 = vrcp.f32 %v938_v31  ;;  %v1016_v18 = vlaneseq  ;;  %vm1027_vm6 = vcmask 130112  }
  0xcd   :  { %794 = vadd.xlane.f32.xlu1 %v793_v59  ;;  %746 = vadd.xlane.f32.xlu0 %v745_v21  ;;  %v822_v39 = vpop.xlane.xlu0 %821  ;;  %v831_v48 = vpop.xlane.xlu1 %830  ;;  %1284 = vrcp.f32 %v888_v14  ;;  %v939_v55 = vadd.f32 1e-08, %v875_v36  ;;  %vm1034_vm7 = vcmask 195712   ;;  %vm1041_vm12 = vcmask 261312  }
  0xce   :  { %1286 = vrcp.f32 %v889_v0  ;;  %v876_v27 = vsub.f32 256.0, %v822_v39  ;;  %v879_v45 = vsub.f32 256.0, %v831_v48  ;;  %v892_v10 = vadd.f32 1e-08, %v822_v39 }
  0xcf   :  { %1288 = vrcp.f32 %v937_v15  ;;  %v895_v22 = vadd.f32 1e-08, %v831_v48  ;;  %v2256_v20 = vand.u32 127, %v1016_v18  ;;  %v2260_v57 = vshrl.u32 %v1016_v18, 7 }
  0xd0   :  { %1290 = vrcp.f32 %v891_v54  ;;  %v940_v28 = vadd.f32 1e-08, %v876_v27  ;;  %v943_v16 = vadd.f32 1e-08, %v879_v45  ;;  %vm1048_vm13 = vcmask 326912  }
  0xd1   :  { %797 = vadd.xlane.f32.xlu1 %v796_v37  ;;  %749 = vadd.xlane.f32.xlu0 %v748_v25  ;;  %v828_v50 = vpop.xlane.xlu0 %827  ;;  %v2216_v46 = vpop.xlane.xlu1 %836  ;;  %v877_v25 = vsub.f32 256.0, %v825_v19  ;;  %1292 = vrcp.f32 %v939_v55  ;;  %v1022_v2 = vadd.s32 4294967288, %v2256_v20  ;;  %v1029_v39 = vadd.s32 4294967280, %v2256_v20 }
  0xd2   :  { %v878_v29 = vsub.f32 256.0, %v828_v50  ;;  %v881_v52 = vsub.f32 256.0, %v2216_v46  ;;  %v894_v58 = vadd.f32 1e-08, %v828_v50  ;;  %v897_v26 = vadd.f32 1e-08, %v2216_v46 }
  0xd3   :  { %v941_v1 = vadd.f32 1e-08, %v877_v25  ;;  %v1020_v12 = vsub.s32 %v2256_v20, %v2260_v57  ;;  %v1025_v14 = vsub.s32 %v1022_v2, %v2260_v57  ;;  %v2281_v27 = vadd.s32 4294967272, %v2256_v20 }
  0xd4   :  { %v942_v35 = vadd.f32 1e-08, %v878_v29  ;;  %v945_v56 = vadd.f32 1e-08, %v881_v52  ;;  %v2284_v45 = vadd.s32 4294967264, %v2256_v20  ;;  %vm1055_vm14 = vcmask 392512  }
  0xd5   :  { %800 = vadd.xlane.f32.xlu1 %v799_v41  ;;  %752 = vadd.xlane.f32.xlu0 %v751_v40  ;;  %v2218_v7 = vpop.xlane.xlu0 %833  ;;  %v2220_v5 = vpop.xlane.xlu1 %842  ;;  %v893_v40 = vadd.f32 1e-08, %v825_v19  ;;  %vm1062_vm15 = vcmask 458112   ;;  %vm1069_vm0 = vcmask 523712   ;;  %vm1076_vm1 = vcmask 589312  }
  0xd6   :  { %v896_v63 = vadd.f32 1e-08, %v2218_v7  ;;  %v883_v19 = vsub.f32 256.0, %v2220_v5  ;;  %vm1083_vm2 = vcmask 654912   ;;  %vm1090_vm3 = vcmask 720512  }
  0xd7   :  { %1294 = vrcp.f32 %v893_v40  ;;  %vm1097_vm4 = vcmask 786112   ;;  %vm1104_vm5 = vcmask 851712   ;;  %vm1111_vm10 = vcmask 917312  }
  0xd8   :  { %1296 = vrcp.f32 %v941_v1  ;;  %v947_v54 = vadd.f32 1e-08, %v883_v19  ;;  %vm1118_vm11 = vcmask 982912   ;;  %vm1125_vm9 = vcmask 1048512  }
  0xd9   :  { %803 = vadd.xlane.f32.xlu1 %v802_v43  ;;  %755 = vadd.xlane.f32.xlu0 %v754_v47  ;;  %v1279_v43 = vpop.eup %1278  ;;  %1298 = vrcp.f32 %v892_v10 }
  0xda   :  { %v1281_v47 = vpop.eup %1280  ;;  %1300 = vrcp.f32 %v940_v28 }
  0xdb   :  { %1302 = vrcp.f32 %v895_v22 }
  0xdc   :  { %1304 = vrcp.f32 %v943_v16  ;;  %v2296_v16 = vadd.s32 4294967256, %v2256_v20 }
  0xdd   :  { %806 = vadd.xlane.f32.xlu1 %v805_v9  ;;  %758 = vadd.xlane.f32.xlu0 %v757_v32  ;;  %v880_v9 = vsub.f32 256.0, %v2218_v7  ;;  %v1283_v32 = vpop.eup %1282  ;;  %v899_v7 = vadd.f32 1e-08, %v2220_v5  ;;  %v1032_v5 = vsub.s32 %v1029_v39, %v2260_v57  ;;  %1306 = vrcp.f32 %v894_v58 }
  0xde   :  { %v1285_v6 = vpop.eup %1284  ;;  %1308 = vrcp.f32 %v942_v35  ;;  %v1039_v35 = vsub.s32 %v2281_v27, %v2260_v57 }
  0xdf   :  { %1310 = vrcp.f32 %v897_v26 }
  0xe0   :  { %1312 = vrcp.f32 %v945_v56 }
  0xe1   :  { %1314 = vrcp.f32 %v896_v63 }
  0xec   :  { %v2222_v59 = vpop.xlane.xlu0 %839 }
  0xed   :  { %v898_v28 = vadd.f32 1e-08, %v2222_v59 }
  0xf5   :  { %v2224_v42 = vpop.xlane.xlu1 %848 }
  0xf6   :  { %v885_v29 = vsub.f32 256.0, %v2224_v42 }
  0xf7   :  { %v2226_v51 = vpop.xlane.xlu0 %845 }
  0xf8   :  { %v884_v10 = vsub.f32 256.0, %v2226_v51 }
  0xf9   :  { %v2228_v33 = vpop.xlane.xlu1 %854 }
  0xfa   :  { %v903_v27 = vadd.f32 1e-08, %v2228_v33 }
  0xff   :  { %v2230_v21 = vpop.xlane.xlu0 %851 }
 0x100   :  { %v886_v39 = vsub.f32 256.0, %v2230_v21 }
 0x11b   :  { %v2232_v34 = vpop.xlane.xlu1 %764 }
 0x12a   :  { %v762_v11 = vpop.xlane.xlu0 %761 }
 0x12e   :  { %v768_v53 = vpop.xlane.xlu1 %767  ;;  %v2234_v38 = vpop.xlane.xlu0 %713 }
 0x12f   :  { %v856_v24 = vsub.f32 %v762_v11, %v2234_v38  ;;  %v1287_v11 = vpop.eup %1286  ;;  %v905_v61 = vmul.f32 %v1285_v6, %v2234_v38 }
 0x130   :  { %v1289_v60 = vpop.eup %1288 }
 0x131   :  { %v953_v62 = vmul.f32 %v1281_v47, %v856_v24  ;;  %v1291_v55 = vpop.eup %1290  ;;  %v949_v47 = vadd.f32 1e-08, %v885_v29 }
 0x132   :  { %v2236_v8 = vpop.xlane.xlu1 %770  ;;  %v2238_v49 = vpop.xlane.xlu0 %719 }
 0x133   :  { %v858_v23 = vsub.f32 %v768_v53, %v2238_v49  ;;  %v944_v53 = vadd.f32 1e-08, %v880_v9  ;;  %v909_v4 = vmul.f32 %v1279_v43, %v2238_v49  ;;  %v984_v31 = vadd.f32 %v953_v62, %v905_v61 }
 0x134   :  { %v882_v49 = vsub.f32 256.0, %v2222_v59  ;;  %v2307_v9 = vadd.s32 4294967248, %v2256_v20  ;;  %v1046_v62 = vsub.s32 %v2284_v45, %v2260_v57 }
 0x135   :  { %v957_v48 = vmul.f32 %v1283_v32, %v858_v23  ;;  %v1021_v18 = vrot.slane %v984_v31, %v1020_v12  ;;  %v1293_v23 = vpop.eup %1292  ;;  %1316 = vrcp.f32 %v944_v53  ;;  %v948_v32 = vadd.f32 1e-08, %v884_v10 }
 0x136   :  { %v2240_v37 = vpop.xlane.xlu1 %773  ;;  %v2242_v13 = vpop.xlane.xlu0 %722  ;;  %v946_v43 = vadd.f32 1e-08, %v882_v49  ;;  %1318 = vrcp.f32 %v899_v7  ;;  %v2329_v12 = vadd.s32 4294967232, %v2256_v20 }
 0x137   :  { %v986_v36 = vadd.f32 %v957_v48, %v909_v4  ;;  %v859_v22 = vsub.f32 %v2236_v8, %v2242_v13  ;;  %v1295_v26 = vpop.eup %1294  ;;  %1320 = vrcp.f32 %v947_v54  ;;  %v2319_v48 = vadd.s32 4294967240, %v2256_v20 }
 0x138   :  { %v1297_v63 = vpop.eup %1296  ;;  %1322 = vrcp.f32 %v898_v28  ;;  %v911_v7 = vmul.f32 %v1291_v55, %v2242_v13  ;;  %v902_v4 = vadd.f32 1e-08, %v2230_v21 }
 0x139   :  { %v1033_v1 = vrot.slane %v986_v36, %v1032_v5  ;;  %v959_v56 = vmul.f32 %v1293_v23, %v859_v22  ;;  %v1299_v19 = vpop.eup %1298  ;;  %1324 = vrcp.f32 %v946_v43  ;;  %v1067_v54 = vsub.s32 %v2319_v48, %v2260_v57 }
 0x13a   :  { %v2244_v30 = vpop.xlane.xlu1 %776  ;;  %v2246_v41 = vpop.xlane.xlu0 %725  ;;  %1326 = vrcp.f32 %v949_v47 }
 0x13b   :  { %v860_v59 = vsub.f32 %v2240_v37, %v2246_v41  ;;  %v1053_v37 = vsub.s32 %v2296_v16, %v2260_v57  ;;  %1328 = vrcp.f32 %v948_v32  ;;  %v987_v31 = vadd.f32 %v959_v56, %v911_v7 }
 0x13e   :  { %v2251_v3 = vpop.xlane.xlu1 %779  ;;  %v2253_v44 = vpop.xlane.xlu0 %728 }
 0x13f   :  { %v861_v61 = vsub.f32 %v2244_v30, %v2253_v44  ;;  %v915_v29 = vmul.f32 %v1295_v26, %v2253_v44 }
 0x141   :  { %v963_v21 = vmul.f32 %v1297_v63, %v861_v61  ;;  %v2366_v63 = vadd.s32 4294967208, %v2256_v20 }
 0x142   :  { %v717_v50 = vpop.xlane.xlu1 %716  ;;  %v2265_v46 = vpop.xlane.xlu0 %731 }
 0x143   :  { %v857_v17 = vsub.f32 %v2232_v34, %v717_v50  ;;  %v907_v0 = vmul.f32 %v1287_v11, %v717_v50  ;;  %v1301_v50 = vpop.eup %1300  ;;  %v900_v11 = vadd.f32 1e-08, %v2226_v51  ;;  %v1060_v51 = vsub.s32 %v2307_v9, %v2260_v57 }
 0x144   :  { %v961_v53 = vmul.f32 %v1301_v50, %v860_v59  ;;  %v862_v5 = vsub.f32 %v2251_v3, %v2265_v46  ;;  %v1040_v3 = vrot.slane %v987_v31, %v1039_v35  ;;  %v989_v23 = vadd.f32 %v963_v21, %v915_v29 }
 0x145   :  { %v955_v15 = vmul.f32 %v1289_v60, %v857_v17  ;;  %v2325_v17 = vpop.eup %1302  ;;  %v901_v60 = vadd.f32 1e-08, %v2224_v42  ;;  %v950_v42 = vadd.f32 1e-08, %v886_v39  ;;  %1330 = vrcp.f32 %v900_v11 }
 0x146   :  { %v2275_v38 = vpop.xlane.xlu1 %782  ;;  %v2277_v34 = vpop.xlane.xlu0 %734  ;;  %v1054_v7 = vrot.slane %v989_v23, %v1053_v37 }
 0x147   :  { %v985_v25 = vadd.f32 %v955_v15, %v907_v0  ;;  %v887_v0 = vsub.f32 256.0, %v2228_v33  ;;  %v913_v15 = vmul.f32 %v1299_v19, %v2246_v41  ;;  %1332 = vrcp.f32 %v901_v60 }
 0x148   :  { %v1074_v41 = vsub.s32 %v2329_v12, %v2260_v57  ;;  %1334 = vrcp.f32 %v902_v4  ;;  %v2354_v33 = vadd.s32 4294967216, %v2256_v20  ;;  %v2371_v19 = vadd.s32 4294967200, %v2256_v20 }
 0x149   :  { %v1026_v40 = vrot.slane %v985_v25, %v1025_v14  ;;  %v1305_v14 = vpop.eup %1304  ;;  %v2345_v25 = vadd.s32 4294967224, %v2256_v20  ;;  %v988_v45 = vadd.f32 %v961_v53, %v913_v15  ;;  %v951_v22 = vadd.f32 1e-08, %v887_v0 }
 0x14a   :  { %v2290_v52 = vpop.xlane.xlu1 %785  ;;  %v2292_v24 = vpop.xlane.xlu0 %737  ;;  %1336 = vrcp.f32 %v950_v42  ;;  %v919_v61 = vmul.f32 %v2325_v17, %v2277_v34  ;;  %v1106_v0 = vadd.s32 4294967192, %v2256_v20 }
 0x14b   :  { %v1028_v58 = vsel %vm1027_vm6, %v1026_v40, %v1021_v18  ;;  %v1307_v36 = vpop.eup %1306  ;;  %v863_v18 = vsub.f32 %v2275_v38, %v2277_v34  ;;  %v864_v44 = vsub.f32 %v2290_v52, %v2292_v24  ;;  %v1081_v38 = vsub.s32 %v2345_v25, %v2260_v57 }
 0x14c   :  { %v2302_v8 = vsel %vm1034_vm7, %v1033_v1, %v1028_v58  ;;  %v1309_v49 = vpop.eup %1308  ;;  %v1047_v26 = vrot.slane %v988_v45, %v1046_v62  ;;  %v917_v47 = vmul.f32 %v1307_v36, %v2265_v46  ;;  %1338 = vrcp.f32 %v903_v27 }
 0x14d   :  { %v1311_v55 = vpop.eup %1310  ;;  %v965_v28 = vmul.f32 %v1309_v49, %v862_v5  ;;  %v1042_v43 = vsel %vm1041_vm12, %v1040_v3, %v2302_v8  ;;  %v967_v8 = vmul.f32 %v1305_v14, %v863_v18  ;;  %1340 = vrcp.f32 %v951_v22 }
 0x14e   :  { %v2311_v2 = vpop.xlane.xlu1 %788  ;;  %v2313_v6 = vpop.xlane.xlu0 %740  ;;  %v1049_v46 = vsel %vm1048_vm13, %v1047_v26, %v1042_v43  ;;  %v1095_v14 = vsub.s32 %v2366_v63, %v2260_v57  ;;  %v1102_v18 = vsub.s32 %v2371_v19, %v2260_v57  ;;  %v1120_v63 = vadd.s32 4294967176, %v2256_v20 }
 0x14f   :  { %v1313_v1 = vpop.eup %1312  ;;  %v865_v59 = vsub.f32 %v2311_v2, %v2313_v6  ;;  %v990_v50 = vadd.f32 %v965_v28, %v917_v47  ;;  %v1056_v16 = vsel %vm1055_vm14, %v1054_v7, %v1049_v46  ;;  %v991_v37 = vadd.f32 %v967_v8, %v919_v61 }
 0x150   :  { %v1315_v58 = vpop.eup %1314  ;;  %v923_v49 = vmul.f32 %v1311_v55, %v2313_v6 }
 0x151   :  { %v1317_v35 = vpop.eup %1316  ;;  %v971_v31 = vmul.f32 %v1313_v1, %v865_v59  ;;  %v921_v15 = vmul.f32 %v1315_v58, %v2292_v24  ;;  %v1061_v21 = vrot.slane %v990_v50, %v1060_v51  ;;  %v1068_v9 = vrot.slane %v991_v37, %v1067_v54 }
 0x152   :  { %v2334_v13 = vpop.xlane.xlu1 %791  ;;  %v2336_v30 = vpop.xlane.xlu0 %743  ;;  %v969_v60 = vmul.f32 %v1317_v35, %v864_v44  ;;  %v1109_v35 = vsub.s32 %v1106_v0, %v2260_v57 }
 0x153   :  { %v1319_v32 = vpop.eup %1318  ;;  %v866_v52 = vsub.f32 %v2334_v13, %v2336_v30  ;;  %v1088_v13 = vsub.s32 %v2354_v33, %v2260_v57  ;;  %v1063_v1 = vsel %vm1062_vm15, %v1061_v21, %v1056_v16  ;;  %v993_v22 = vadd.f32 %v971_v31, %v923_v49 }
 0x154   :  { %v1321_v39 = vpop.eup %1320  ;;  %v992_v3 = vadd.f32 %v969_v60, %v921_v15 }
 0x155   :  { %v1323_v11 = vpop.eup %1322 }
 0x156   :  { %v795_v40 = vpop.xlane.xlu1 %794  ;;  %v747_v10 = vpop.xlane.xlu0 %746  ;;  %v925_v29 = vmul.f32 %v1323_v11, %v2336_v30  ;;  %v1113_v30 = vadd.s32 4294967184, %v2256_v20  ;;  %v1075_v48 = vrot.slane %v992_v3, %v1074_v41 }
 0x157   :  { %v867_v2 = vsub.f32 %v795_v40, %v747_v10  ;;  %v1325_v4 = vpop.eup %1324  ;;  %v927_v28 = vmul.f32 %v1319_v32, %v747_v10  ;;  %v1070_v10 = vsel %vm1069_vm0, %v1068_v9, %v1063_v1  ;;  %v1082_v32 = vrot.slane %v993_v22, %v1081_v38 }
 0x158   :  { %v1327_v42 = vpop.eup %1326  ;;  %v973_v34 = vmul.f32 %v1325_v4, %v866_v52  ;;  %v1077_v11 = vsel %vm1076_vm1, %v1075_v48, %v1070_v10  ;;  %v1123_v38 = vsub.s32 %v1120_v63, %v2260_v57 }
 0x159   :  { %v1329_v36 = vpop.eup %1328  ;;  %v975_v27 = vmul.f32 %v1321_v39, %v867_v2  ;;  %v1084_v7 = vsel %vm1083_vm2, %v1082_v32, %v1077_v11 }
 0x15a   :  { %v798_v56 = vpop.xlane.xlu1 %797  ;;  %v750_v62 = vpop.xlane.xlu0 %749  ;;  %v994_v6 = vadd.f32 %v973_v34, %v925_v29 }
 0x15b   :  { %v868_v53 = vsub.f32 %v798_v56, %v750_v62  ;;  %v1331_v24 = vpop.eup %1330  ;;  %v995_v44 = vadd.f32 %v975_v27, %v927_v28 }
 0x15c   :  { %v1333_v58 = vpop.eup %1332  ;;  %v929_v51 = vmul.f32 %v1331_v24, %v750_v62  ;;  %v1089_v19 = vrot.slane %v994_v6, %v1088_v13  ;;  %v1116_v62 = vsub.s32 %v1113_v30, %v2260_v57 }
 0x15d   :  { %v977_v40 = vmul.f32 %v1329_v36, %v868_v53  ;;  %v1335_v43 = vpop.eup %1334  ;;  %v1096_v12 = vrot.slane %v995_v44, %v1095_v14 }
 0x15e   :  { %v801_v17 = vpop.xlane.xlu1 %800  ;;  %v753_v5 = vpop.xlane.xlu0 %752  ;;  %v1091_v4 = vsel %vm1090_vm3, %v1089_v19, %v1084_v7 }
 0x15f   :  { %v869_v45 = vsub.f32 %v801_v17, %v753_v5  ;;  %v931_v26 = vmul.f32 %v1333_v58, %v753_v5  ;;  %v1337_v59 = vpop.eup %1336  ;;  %v996_v54 = vadd.f32 %v977_v40, %v929_v51  ;;  %v1098_v13 = vsel %vm1097_vm4, %v1096_v12, %v1091_v4 }
 0x160   :  { %v1339_v50 = vpop.eup %1338 }
 0x161   :  { %v979_v33 = vmul.f32 %v1327_v42, %v869_v45  ;;  %v1341_v20 = vpop.eup %1340  ;;  %v1103_v25 = vrot.slane %v996_v54, %v1102_v18 }
 0x162   :  { %v804_v55 = vpop.xlane.xlu1 %803  ;;  %v756_v23 = vpop.xlane.xlu0 %755 }
 0x163   :  { %v870_v47 = vsub.f32 %v804_v55, %v756_v23  ;;  %v997_v8 = vadd.f32 %v979_v33, %v931_v26  ;;  %v933_v52 = vmul.f32 %v1335_v43, %v756_v23  ;;  %v1105_v0 = vsel %vm1104_vm5, %v1103_v25, %v1098_v13 }
 0x165   :  { %v981_v56 = vmul.f32 %v1337_v59, %v870_v47  ;;  %v1110_v61 = vrot.slane %v997_v8, %v1109_v35 }
 0x166   :  { %v807_v39 = vpop.xlane.xlu1 %806  ;;  %v759_v46 = vpop.xlane.xlu0 %758 }
 0x167   :  { %v998_v41 = vadd.f32 %v981_v56, %v933_v52  ;;  %v871_v2 = vsub.f32 %v807_v39, %v759_v46  ;;  %v935_v60 = vmul.f32 %v1339_v50, %v759_v46  ;;  %v1112_v57 = vsel %vm1111_vm10, %v1110_v61, %v1105_v0 }
 0x169   :  { %v983_v53 = vmul.f32 %v1341_v20, %v871_v2  ;;  %v1117_v31 = vrot.slane %v998_v41, %v1116_v62 }
 0x16b   :  { %v999_v14 = vadd.f32 %v983_v53, %v935_v60  ;;  %v1119_v16 = vsel %vm1118_vm11, %v1117_v31, %v1112_v57 }
 0x16d   :  { %v1124_v42 = vrot.slane %v999_v14, %v1123_v38 }
 0x16f   :  { %v1126_v37 = vsel %vm1125_vm9, %v1124_v42, %v1119_v16 }
 0x170   :  { %1128 = vst [vmem:[#allocation7] sm:$0x1] %v1126_v37 }
 0x171   :  { %1393 = shalt.err (!%p1390_p0)
}
 0x172   :  { %1138 = dma.vmem_to_hbm [thread:$0]  %s1136_s1, 16, %s2418_s2, [#allocation4]  }
 0x173   :  { %1406 = dma.done.wait [#allocation4], 16  }
 0x174   :  { %1407 = vsyncadd [#allocation4], 4294967280 }
 0x175   :  { %1142 = vsyncpa [#allocation3], 1 }
 0x176   :  { %1143 = vsyncpa [#allocation6], 1 }
 0x177   :  { %1144 = vsyncpa [#allocation4], 1 }

</bundles_post_ra>
